<compile_context>
chip_gen: v6e
topology: v6e:2x2x1
jax: 0.10.0
libtpu: 0.0.40
codegen_flags: <defaults>
</compile_context>

<pallas_src>
import functools
from typing import NamedTuple

import jax
import jax.numpy as jnp
import numpy as np
from jax.experimental import pallas as pl
from jax.experimental.pallas import tpu as pltpu

C_IN = 256
C_SQ = 64


# --------------------------------------------------------------------------
# Chip-generation configuration
# --------------------------------------------------------------------------
class _ChipConfig(NamedTuple):
    is_v5e: bool
    num_tc: int            # TensorCores sharing the grid (megacore)
    vmem_cap_limit: int    # max vmem_limit_bytes we will ever request
    block_target: int      # target x-block bytes for the single-pass path


def _chip_config() -> _ChipConfig:
    kind = ""
    try:
        kind = jax.devices()[0].device_kind.lower()
    except Exception:
        pass
    is_v5e = ("v5 lite" in kind) or ("v5e" in kind) or ("v5lite" in kind)
    is_v7 = ("v7" in kind) or ("7x" in kind)
    try:
        phys = int(pltpu.get_tpu_info().vmem_capacity_bytes)
    except Exception:
        phys = (64 << 20) if is_v7 else (128 << 20)
    # Leave ~25% of physical VMEM for the compiler; hard-cap per generation
    # (~48 MiB on v7x / 64 MiB physical, ~96 MiB on v5e & v6e / 128 MiB).
    hard_cap = (48 << 20) if is_v7 else (96 << 20)
    vmem_cap_limit = min(max(int(phys * 3 // 4), 32 << 20), hard_cap)
    num_tc = 2 if is_v7 else 1
    block_target = (4 << 20) if is_v7 else (8 << 20)
    return _ChipConfig(is_v5e, num_tc, vmem_cap_limit, block_target)


# --------------------------------------------------------------------------
# Kernels
# --------------------------------------------------------------------------
def _se_kernel(x_ref, w1t_ref, b1_ref, w2t_ref, b2_ref, o_ref, *,
               inv_hw, native_mul):
    """Single-pass kernel: whole (B_TILE, C, HW) image block resident in VMEM."""
    # Global average pool over spatial positions (lane reduce), f32 accumulate.
    pooled = jnp.sum(x_ref[...].astype(jnp.float32), axis=2) * inv_hw

    # fc1 (1x1 conv == matmul) + ReLU -> (B_TILE, C_SQ).
    h = jnp.dot(pooled, w1t_ref[...], preferred_element_type=jnp.float32)
    h = jnp.maximum(h + b1_ref[...], 0.0)

    # fc2 + sigmoid -> (B_TILE, C).
    s = jnp.dot(h, w2t_ref[...], preferred_element_type=jnp.float32)
    s = jax.nn.sigmoid(s + b2_ref[...])

    if native_mul:
        # v6e/v7x (bf16 VALU) or f32 input: multiply in the storage dtype; the
        # tile is never round-tripped through f32.
        o_ref[...] = x_ref[...] * s.astype(o_ref.dtype)[:, :, None]
    else:
        # v5e bf16: no bf16 VALU — keep the multiply in f32, cast at the store.
        o_ref[...] = (x_ref[...].astype(jnp.float32) * s[:, :, None]
                      ).astype(o_ref.dtype)


def _pool_fc_kernel(x_ref, w1t_ref, b1_ref, w2t_ref, b2_ref, s_ref, *,
                    total_hw):
    """Two-phase path, sweep 1: accumulate the pool over HW tiles, then fc."""
    hstep = pl.program_id(1)
    hw_tile = x_ref.shape[2]

    @pl.when(hstep == 0)
    def _():
        s_ref[...] = jnp.zeros_like(s_ref)

    xf = x_ref[...].astype(jnp.float32)
    if total_hw % hw_tile != 0:
        # Last HW tile is partial: mask the padded lanes out of the sum.
        lane = jax.lax.broadcasted_iota(jnp.int32, xf.shape, 2)
        xf = jnp.where(hstep * hw_tile + lane < total_hw, xf, 0.0)
    s_ref[...] += jnp.sum(xf, axis=2)

    @pl.when(hstep == pl.num_programs(1) - 1)
    def _():
        pooled = s_ref[...] * (1.0 / total_hw)
        h = jnp.dot(pooled, w1t_ref[...], preferred_element_type=jnp.float32)
        h = jnp.maximum(h + b1_ref[...], 0.0)
        s = jnp.dot(h, w2t_ref[...], preferred_element_type=jnp.float32)
        s_ref[...] = jax.nn.sigmoid(s + b2_ref[...])


def _rescale_kernel(s_ref, x_ref, o_ref, *, native_mul):
    """Two-phase path, sweep 2: channel-wise rescale of an HW tile."""
    s = s_ref[...]
    if native_mul:
        o_ref[...] = x_ref[...] * s.astype(o_ref.dtype)[:, :, None]
    else:
        o_ref[...] = (x_ref[...].astype(jnp.float32) * s[:, :, None]
                      ).astype(o_ref.dtype)


# --------------------------------------------------------------------------
# Paths
# --------------------------------------------------------------------------
def _single_pass(x, w1t, b1r, w2t, b2r, cfg, native_mul):
    """Whole image resident: 1 read + 1 write of x."""
    N, C, HW = x.shape
    itemsize = x.dtype.itemsize
    bytes_per_image = C * HW * itemsize

    b_tile = max(1, cfg.block_target // bytes_per_image)
    # Keep double-buffered in+out under the per-generation VMEM cap.
    b_tile = min(b_tile,
                 max(1, (cfg.vmem_cap_limit - (3 << 20)) // (4 * bytes_per_image)))
    if cfg.num_tc > 1 and N >= 2 * cfg.num_tc:
        # v7x megacore: >= 2 grid steps per core so writeback of step i
        # overlaps the fetch of step i+1, but keep blocks >= ~1 MiB.
        min_b = max(1, (1 << 20) // bytes_per_image)
        b_tile = min(b_tile, max(N // (2 * cfg.num_tc), min_b))
    b_tile = int(max(1, min(b_tile, N)))

    grid = (pl.cdiv(N, b_tile),)
    block_bytes = b_tile * bytes_per_image
    # Always set the limit: v5e's scoped default (16 MiB) is easily exceeded.
    vmem_limit = min(cfg.vmem_cap_limit,
                     max(4 * block_bytes + (3 << 20), 32 << 20))

    cost = pl.CostEstimate(
        flops=2 * N * (C_IN * C_SQ + C_SQ * C_IN) + 2 * N * C * HW,
        transcendentals=N * C,
        bytes_accessed=2 * N * C * HW * itemsize
        + (2 * C_IN * C_SQ + C_SQ + C_IN) * 4,
    )

    kernel = functools.partial(_se_kernel, inv_hw=1.0 / HW,
                               native_mul=native_mul)
    return pl.pallas_call(
        kernel,
        out_shape=jax.ShapeDtypeStruct((N, C, HW), x.dtype),
        grid_spec=pltpu.PrefetchScalarGridSpec(
            num_scalar_prefetch=0,
            grid=grid,
            in_specs=[
                pl.BlockSpec((b_tile, C, HW), lambda n: (n, 0, 0)),
                pl.BlockSpec((C_IN, C_SQ), lambda n: (0, 0)),
                pl.BlockSpec((1, C_SQ), lambda n: (0, 0)),
                pl.BlockSpec((C_SQ, C_IN), lambda n: (0, 0)),
                pl.BlockSpec((1, C_IN), lambda n: (0, 0)),
            ],
            out_specs=pl.BlockSpec((b_tile, C, HW), lambda n: (n, 0, 0)),
        ),
        compiler_params=pltpu.CompilerParams(
            dimension_semantics=("parallel",),
            vmem_limit_bytes=vmem_limit),
        cost_estimate=cost,
    )(x, w1t, b1r, w2t, b2r)


def _two_phase(x, w1t, b1r, w2t, b2r, cfg, native_mul):
    """HW-tiled fallback for images too large to keep resident in VMEM."""
    N, C, HW = x.shape
    itemsize = x.dtype.itemsize

    # Batch tile: full N if N < 8 else a multiple of 8 (keeps the (8,128)
    # sublane rule on the (b_tile, C) scale blocks).
    b_tile = N if N < 8 else 8

    # HW tile: a multiple of 128 (lane-dense loads/stores) sized to ~3 MiB
    # blocks; use the full HW when it already fits a single tile.
    target = 3 << 20
    max_lanes = max(128, (target // (b_tile * C * itemsize)) // 128 * 128)
    hw_tile = HW if HW <= max_lanes else max_lanes

    nb = pl.cdiv(N, b_tile)
    nh = pl.cdiv(HW, hw_tile)
    block_bytes = b_tile * C * hw_tile * itemsize
    vmem_limit = min(cfg.vmem_cap_limit,
                     max(6 * block_bytes + (3 << 20), 32 << 20))

    # Sweep 1: pool over HW tiles + fc1/relu/fc2/sigmoid -> s (N, C) f32.
    pool_kernel = functools.partial(_pool_fc_kernel, total_hw=HW)
    s = pl.pallas_call(
        pool_kernel,
        out_shape=jax.ShapeDtypeStruct((N, C), jnp.float32),
        grid_spec=pltpu.PrefetchScalarGridSpec(
            num_scalar_prefetch=0,
            grid=(nb, nh),
            in_specs=[
                pl.BlockSpec((b_tile, C, hw_tile), lambda b, h: (b, 0, h)),
                pl.BlockSpec((C_IN, C_SQ), lambda b, h: (0, 0)),
                pl.BlockSpec((1, C_SQ), lambda b, h: (0, 0)),
                pl.BlockSpec((C_SQ, C_IN), lambda b, h: (0, 0)),
                pl.BlockSpec((1, C_IN), lambda b, h: (0, 0)),
            ],
            out_specs=pl.BlockSpec((b_tile, C), lambda b, h: (b, 0)),
        ),
        compiler_params=pltpu.CompilerParams(
            dimension_semantics=("parallel", "arbitrary"),
            vmem_limit_bytes=vmem_limit),
        cost_estimate=pl.CostEstimate(
            flops=N * C * HW + 2 * N * (C_IN * C_SQ + C_SQ * C_IN),
            transcendentals=N * C,
            bytes_accessed=N * C * HW * itemsize + N * C * 4),
    )(x, w1t, b1r, w2t, b2r)

    # Sweep 2: stream HW tiles again and rescale.
    resc_kernel = functools.partial(_rescale_kernel, native_mul=native_mul)
    out = pl.pallas_call(
        resc_kernel,
        out_shape=jax.ShapeDtypeStruct((N, C, HW), x.dtype),
        grid_spec=pltpu.PrefetchScalarGridSpec(
            num_scalar_prefetch=0,
            grid=(nb, nh),
            in_specs=[
                pl.BlockSpec((b_tile, C), lambda b, h: (b, 0)),
                pl.BlockSpec((b_tile, C, hw_tile), lambda b, h: (b, 0, h)),
            ],
            out_specs=pl.BlockSpec((b_tile, C, hw_tile), lambda b, h: (b, 0, h)),
        ),
        compiler_params=pltpu.CompilerParams(
            dimension_semantics=("parallel", "parallel"),
            vmem_limit_bytes=vmem_limit),
        cost_estimate=pl.CostEstimate(
            flops=N * C * HW,
            transcendentals=0,
            bytes_accessed=2 * N * C * HW * itemsize + N * C * 4),
    )(s, x)
    return out


# --------------------------------------------------------------------------
# Public wrapper
# --------------------------------------------------------------------------
def squeeze_excitation(x_nchw, w1, b1, w2, b2, *, force_two_phase=False):
    """x_nchw: (N, 256, H, W).  w1: (64, 256), b1: (64,), w2: (256, 64), b2: (256,)."""
    N, C, H, W = x_nchw.shape
    assert C == C_IN
    HW = H * W
    itemsize = x_nchw.dtype.itemsize

    cfg = _chip_config()

    # Free reshape (no data movement): NCHW -> (N, C, HW).
    # TODO(synk): for production SE stages where HW % 128 != 0 (7x7, 14x14),
    # fold channel groups into the lane axis / pad HW in the HBM layout so the
    # stored block's lane dim is 128-aligned (masked partial stores waste BW).
    x = x_nchw.reshape(N, C, HW)

    w1t = w1.T                      # (C_IN, C_SQ)
    b1r = b1.reshape(1, C_SQ)
    w2t = w2.T                      # (C_SQ, C_IN)
    b2r = b2.reshape(1, C_IN)

    # bf16-native multiply only on chips with a bf16 VALU; f32 path is a no-op
    # cast anyway for f32 inputs.
    native_mul = (x.dtype == jnp.float32) or (not cfg.is_v5e)

    bytes_per_image = C_IN * HW * itemsize
    fits_single = (4 * bytes_per_image + (3 << 20)) <= cfg.vmem_cap_limit

    if fits_single and not force_two_phase:
        out = _single_pass(x, w1t, b1r, w2t, b2r, cfg, native_mul)
    else:
        out = _two_phase(x, w1t, b1r, w2t, b2r, cfg, native_mul)

    # Free reshape back: (N, C, HW) -> NCHW.
    return out.reshape(N, C, H, W)


def _reference(x_nchw, w1, b1, w2, b2):
    pooled = jnp.mean(x_nchw, axis=(2, 3))                       # (N, C)
    h = jnp.maximum(pooled @ w1.T + b1, 0.0)                     # (N, 64)
    s = jax.nn.sigmoid(h @ w2.T + b2)                            # (N, C)
    return x_nchw * s[:, :, None, None]


if __name__ == "__main__":
    key = jax.random.PRNGKey(0)
    k_x, k_w1, k_b1, k_w2, k_b2 = jax.random.split(key, 5)

    N, H, W = 2, 16, 16   # HW = 256: lane-dense even NCHW-native
    x = jax.random.normal(k_x, (N, C_IN, H, W), dtype=jnp.float32)

    # Deterministic parameter init (mimics Conv2d kaiming-uniform scale).
    bound1 = 1.0 / np.sqrt(C_IN)
    bound2 = 1.0 / np.sqrt(C_SQ)
    w1 = jax.random.uniform(k_w1, (C_SQ, C_IN), jnp.float32, -bound1, bound1)
    b1 = jax.random.uniform(k_b1, (C_SQ,), jnp.float32, -bound1, bound1)
    w2 = jax.random.uniform(k_w2, (C_IN, C_SQ), jnp.float32, -bound2, bound2)
    b2 = jax.random.uniform(k_b2, (C_IN,), jnp.float32, -bound2, bound2)

    ref = jax.block_until_ready(_reference(x, w1, b1, w2, b2))

    # 1) Single-pass whole-image-resident path (the common case).
    out = jax.block_until_ready(squeeze_excitation(x, w1, b1, w2, b2))
    np.testing.assert_allclose(np.asarray(out), np.asarray(ref),
                               rtol=1e-5, atol=1e-5)

    # 2) Two-phase HW-tiled fallback (used for images too big for VMEM); force
    #    it here so the path is exercised at the small shape.
    out2 = jax.block_until_ready(
        squeeze_excitation(x, w1, b1, w2, b2, force_two_phase=True))
    np.testing.assert_allclose(np.asarray(out2), np.asarray(ref),
                               rtol=1e-5, atol=1e-5)

    # 3) bf16 input exercises the native-dtype rescale on v6e/v7x.
    xb = x.astype(jnp.bfloat16)
    refb = jax.block_until_ready(_reference(xb.astype(jnp.float32), w1, b1, w2, b2))
    outb = jax.block_until_ready(squeeze_excitation(xb, w1, b1, w2, b2))
    np.testing.assert_allclose(np.asarray(outb).astype(np.float32),
                               np.asarray(refb), rtol=5e-2, atol=5e-2)

    print("KERNEL_OK")
</pallas_src>

<mosaic_0001>
module attributes {stable_mosaic.version = 11 : i64} {
  func.func @_se_kernel(%arg0: i32, %arg1: memref<2x256x256xf32, #tpu.memory_space<vmem>>, %arg2: memref<256x64xf32, #tpu.memory_space<vmem>>, %arg3: memref<1x64xf32, #tpu.memory_space<vmem>>, %arg4: memref<64x256xf32, #tpu.memory_space<vmem>>, %arg5: memref<1x256xf32, #tpu.memory_space<vmem>>, %arg6: memref<2x256x256xf32, #tpu.memory_space<vmem>>) attributes {dimension_semantics = [#tpu.dimension_semantics<parallel>], iteration_bounds = array<i64: 1>, scalar_prefetch = 0 : i64, scratch_operands = 0 : i64, tpu.core_type = #tpu.core_type<tc>, window_params = [{transform_indices = @transform_0, window_bounds = array<i64: 2, 256, 256>}, {pipeline_mode = #tpu.pipeline_mode<synchronous>, transform_indices = @transform_1, window_bounds = array<i64: 256, 64>}, {pipeline_mode = #tpu.pipeline_mode<synchronous>, transform_indices = @transform_2, window_bounds = array<i64: 1, 64>}, {pipeline_mode = #tpu.pipeline_mode<synchronous>, transform_indices = @transform_3, window_bounds = array<i64: 64, 256>}, {pipeline_mode = #tpu.pipeline_mode<synchronous>, transform_indices = @transform_4, window_bounds = array<i64: 1, 256>}, {transform_indices = @transform_5, window_bounds = array<i64: 2, 256, 256>}]} {
    %c0 = arith.constant 0 : index
    %c0_0 = arith.constant 0 : index
    %c0_1 = arith.constant 0 : index
    %0 = vector.load %arg1[%c0, %c0_0, %c0_1] : memref<2x256x256xf32, #tpu.memory_space<vmem>>, vector<2x256x256xf32>
    %cst = arith.constant dense<0.000000e+00> : vector<2x256xf32>
    %1 = vector.multi_reduction <add>, %0, %cst [2] : vector<2x256x256xf32> to vector<2x256xf32>
    %cst_2 = arith.constant 3.906250e-03 : f32
    %2 = vector.broadcast %cst_2 : f32 to vector<2x256xf32>
    %3 = arith.mulf %1, %2 : vector<2x256xf32>
    %c0_3 = arith.constant 0 : index
    %c0_4 = arith.constant 0 : index
    %4 = vector.load %arg2[%c0_3, %c0_4] : memref<256x64xf32, #tpu.memory_space<vmem>>, vector<256x64xf32>
    %cst_5 = arith.constant dense<0.000000e+00> : vector<2x64xf32>
    %5 = tpu.matmul %3, %4, %cst_5 {dimension_numbers = #tpu.dot_dimension_numbers<[1], [0], [0], [1], [0, 0, 1, 1], [], []>} : vector<2x256xf32>, vector<256x64xf32>, vector<2x64xf32> -> vector<2x64xf32>
    %c0_6 = arith.constant 0 : index
    %c0_7 = arith.constant 0 : index
    %6 = vector.load %arg3[%c0_6, %c0_7] : memref<1x64xf32, #tpu.memory_space<vmem>>, vector<1x64xf32>
    %7 = vector.broadcast %6 : vector<1x64xf32> to vector<2x64xf32>
    %8 = arith.addf %5, %7 : vector<2x64xf32>
    %cst_8 = arith.constant 0.000000e+00 : f32
    %9 = vector.broadcast %cst_8 : f32 to vector<2x64xf32>
    %10 = arith.maximumf %8, %9 : vector<2x64xf32>
    %c0_9 = arith.constant 0 : index
    %c0_10 = arith.constant 0 : index
    %11 = vector.load %arg4[%c0_9, %c0_10] : memref<64x256xf32, #tpu.memory_space<vmem>>, vector<64x256xf32>
    %cst_11 = arith.constant dense<0.000000e+00> : vector<2x256xf32>
    %12 = tpu.matmul %10, %11, %cst_11 {dimension_numbers = #tpu.dot_dimension_numbers<[1], [0], [0], [1], [0, 0, 1, 1], [], []>} : vector<2x64xf32>, vector<64x256xf32>, vector<2x256xf32> -> vector<2x256xf32>
    %c0_12 = arith.constant 0 : index
    %c0_13 = arith.constant 0 : index
    %13 = vector.load %arg5[%c0_12, %c0_13] : memref<1x256xf32, #tpu.memory_space<vmem>>, vector<1x256xf32>
    %14 = vector.broadcast %13 : vector<1x256xf32> to vector<2x256xf32>
    %15 = arith.addf %12, %14 : vector<2x256xf32>
    %16 = arith.negf %15 : vector<2x256xf32>
    %17 = math.exp %16 : vector<2x256xf32>
    %cst_14 = arith.constant 1.000000e+00 : f32
    %18 = vector.broadcast %cst_14 : f32 to vector<2x256xf32>
    %19 = arith.addf %18, %17 : vector<2x256xf32>
    %20 = arith.divf %18, %19 : vector<2x256xf32>
    %c0_15 = arith.constant 0 : index
    %c0_16 = arith.constant 0 : index
    %c0_17 = arith.constant 0 : index
    %21 = vector.load %arg1[%c0_15, %c0_16, %c0_17] : memref<2x256x256xf32, #tpu.memory_space<vmem>>, vector<2x256x256xf32>
    %22 = vector.shape_cast %20 : vector<2x256xf32> to vector<2x256x1xf32>
    %23 = vector.broadcast %22 : vector<2x256x1xf32> to vector<2x256x256xf32>
    %24 = arith.mulf %21, %23 : vector<2x256x256xf32>
    %c0_18 = arith.constant 0 : index
    %c0_19 = arith.constant 0 : index
    %c0_20 = arith.constant 0 : index
    %25 = vector.load %arg6[%c0_18, %c0_19, %c0_20] : memref<2x256x256xf32, #tpu.memory_space<vmem>>, vector<2x256x256xf32>
    tpu.vector_store %arg6[%c0_18, %c0_19, %c0_20], %24 {strides = array<i32>} : memref<2x256x256xf32, #tpu.memory_space<vmem>>, vector<2x256x256xf32>,
    return
  }
  func.func @transform_0(%arg0: i32) -> (i32, i32, i32) {
    %c0_i32 = arith.constant 0 : i32
    %c0_i32_0 = arith.constant 0 : i32
    %c0_i32_1 = arith.constant 0 : i32
    return %arg0, %c0_i32, %c0_i32_0 : i32, i32, i32
  }
  func.func @transform_1(%arg0: i32) -> (i32, i32) {
    %c0_i32 = arith.constant 0 : i32
    %c0_i32_0 = arith.constant 0 : i32
    %c0_i32_1 = arith.constant 0 : i32
    return %c0_i32, %c0_i32_0 : i32, i32
  }
  func.func @transform_2(%arg0: i32) -> (i32, i32) {
    %c0_i32 = arith.constant 0 : i32
    %c0_i32_0 = arith.constant 0 : i32
    %c0_i32_1 = arith.constant 0 : i32
    return %c0_i32, %c0_i32_0 : i32, i32
  }
  func.func @transform_3(%arg0: i32) -> (i32, i32) {
    %c0_i32 = arith.constant 0 : i32
    %c0_i32_0 = arith.constant 0 : i32
    %c0_i32_1 = arith.constant 0 : i32
    return %c0_i32, %c0_i32_0 : i32, i32
  }
  func.func @transform_4(%arg0: i32) -> (i32, i32) {
    %c0_i32 = arith.constant 0 : i32
    %c0_i32_0 = arith.constant 0 : i32
    %c0_i32_1 = arith.constant 0 : i32
    return %c0_i32, %c0_i32_0 : i32, i32
  }
  func.func @transform_5(%arg0: i32) -> (i32, i32, i32) {
    %c0_i32 = arith.constant 0 : i32
    %c0_i32_0 = arith.constant 0 : i32
    %c0_i32_1 = arith.constant 0 : i32
    return %arg0, %c0_i32, %c0_i32_0 : i32, i32, i32
  }
}

</mosaic_0001>

<bundles_post_ra>
// kernel: tpu_custom_call.1
= control target key start
LH: loop header
LB: loop body
LE: loop exit
PB: predicated region body
PF: predicated region fallthrough
CT: control target
= control target key end

     0   :  { %10 = vsyncpa [#allocation3], 0  ;;  %s2375_s0 = inlined_call_operand.hbm [shape: f32[2,256,256], index: 0, kind: input, shape index: {}]   ;;  %s2376_s1 = inlined_call_operand.vmem [shape: f32[256,64], index: 1, kind: input, shape index: {}]   ;;  %s2377_s2 = inlined_call_operand.vmem [shape: f32[1,64], index: 2, kind: input, shape index: {}]   ;;  %s2378_s3 = inlined_call_operand.vmem [shape: f32[64,256], index: 3, kind: input, shape index: {}]   ;;  %s2379_s4 = inlined_call_operand.vmem [shape: f32[1,256], index: 4, kind: input, shape index: {}]   ;;  %s2380_s5 = inlined_call_operand.hbm [shape: f32[2,256,256], index: 5, kind: output, shape index: {}]  }
   0x1   :  { %11 = vsyncpa [#allocation4], 0  ;;  %s1826_s18 = smov [#allocation2]  }
   0x2   :  { %s17_s19 = sshll.u32 %s1826_s18, 4  ;;  %s18_s19 = int_to_ptr.vmem [resolvable:$true] %s17_s19 }
   0x3   :  { %s1790_s20 = scalar_lea.vmem %s18_s19, 16384  ;;  %p1795_p1 = scmp.lt.s32.totalorder %s18_s19, %s18_s19 }
   0x4   :  { %p1791_p0 = scmp.ne.s32.totalorder %s18_s19, %s1790_s20  ;;  %p1796_p2 = scmp.lt.s32.totalorder %s1790_s20, %s1790_s20 }
   0x6   :  { %p1797_p3 = por %p1796_p2, %p1795_p1 }
   0x8   :  { %p1798_p4 = pnand %p1797_p3, %p1791_p0 }
   0xa   :  { %1801 = shalt.err (!%p1798_p4)
}
   0xb   :  { %s1827_s21 = smov 256   ;;  %s1828_s22 = smov 16  }
   0xc   :  { %23 = dma.hbm_to_vmem [thread:$0]  %s2375_s0, 16384, %s18_s19, [#allocation3], %s1827_s21, %s1827_s21, %s1828_s22  }
   0xd   :  { %1822 = dma.done.wait [#allocation3], 16384  }
   0xe   :  { %1823 = vsyncadd [#allocation3], 4294950912  ;;  %v131_v0 = vld [vmem:[#allocation2 + $0x300] sm:$0xff]  ;;  %v132_v1 = vld [vmem:[#allocation2 + $0x308] sm:$0xff]  ;;  %vm533_vm0 = vcmask 130112   ;;  %vm540_vm1 = vcmask 195712  }
   0xf   :  { %v67_v2 = vld [vmem:[#allocation2 + $0x100] sm:$0xff]  ;;  %v307_v3 = vadd.f32 %v132_v1, %v131_v0  ;;  %v68_v4 = vld [vmem:[#allocation2 + $0x108] sm:$0xff]  ;;  %v133_v5 = vld [vmem:[#allocation2 + $0x310] sm:$0xff]  ;;  %vm547_vm2 = vcmask 261312   ;;  %vm554_vm3 = vcmask 326912   ;;  %vm561_vm4 = vcmask 392512  }
  0x10   :  { %v134_v6 = vld [vmem:[#allocation2 + $0x318] sm:$0xff]  ;;  %v211_v7 = vadd.f32 %v68_v4, %v67_v2  ;;  %v69_v8 = vld [vmem:[#allocation2 + $0x110] sm:$0xff]  ;;  %v35_v14 = vld [vmem:[#allocation2] sm:$0xff]  ;;  %vm568_vm5 = vcmask 458112   ;;  %vm575_vm6 = vcmask 523712   ;;  %vm582_vm7 = vcmask 589312  }
  0x11   :  { %v70_v9 = vld [vmem:[#allocation2 + $0x118] sm:$0xff]  ;;  %308 = vadd.xlane.f32.xlu1 %v307_v3  ;;  %v310_v10 = vadd.f32 %v134_v6, %v133_v5  ;;  %v37_v12 = vld [vmem:[#allocation2 + $0x10] sm:$0xff]  ;;  %v36_v15 = vld [vmem:[#allocation2 + $0x8] sm:$0xff]  ;;  %vm589_vm8 = vcmask 654912   ;;  %vm596_vm9 = vcmask 720512   ;;  %vm603_vm10 = vcmask 786112  }
  0x12   :  { %212 = vadd.xlane.f32.xlu0 %v211_v7  ;;  %v214_v11 = vadd.f32 %v70_v9, %v69_v8  ;;  %v38_v13 = vld [vmem:[#allocation2 + $0x18] sm:$0xff]  ;;  %v163_v17 = vadd.f32 %v36_v15, %v35_v14  ;;  %v99_v18 = vld [vmem:[#allocation2 + $0x200] sm:$0xff]  ;;  %v100_v19 = vld [vmem:[#allocation2 + $0x208] sm:$0xff]  ;;  %vm610_vm11 = vcmask 851712   ;;  %vm617_vm12 = vcmask 917312  }
  0x13   :  { %v166_v16 = vadd.f32 %v38_v13, %v37_v12  ;;  %v71_v20 = vld [vmem:[#allocation2 + $0x120] sm:$0xff]  ;;  %v72_v21 = vld [vmem:[#allocation2 + $0x128] sm:$0xff]  ;;  %v259_v22 = vadd.f32 %v100_v19, %v99_v18  ;;  %v101_v26 = vld [vmem:[#allocation2 + $0x210] sm:$0xff]  ;;  %vm624_vm13 = vcmask 982912   ;;  %vm631_vm14 = vcmask 1048512  }
  0x14   :  { %v217_v23 = vadd.f32 %v72_v21, %v71_v20  ;;  %v135_v24 = vld [vmem:[#allocation2 + $0x320] sm:$0xff]  ;;  %v136_v25 = vld [vmem:[#allocation2 + $0x328] sm:$0xff]  ;;  %v102_v27 = vld [vmem:[#allocation2 + $0x218] sm:$0xff]  ;;  %vm870_vm15 = vcmask 1041409  }
  0x15   :  { %311 = vadd.xlane.f32.xlu1 %v310_v10  ;;  %v313_v28 = vadd.f32 %v136_v25, %v135_v24  ;;  %v262_v29 = vadd.f32 %v102_v27, %v101_v26  ;;  %v73_v30 = vld [vmem:[#allocation2 + $0x130] sm:$0xff]  ;;  %v74_v31 = vld [vmem:[#allocation2 + $0x138] sm:$0xff]  ;;  %v39_v32 = vld [vmem:[#allocation2 + $0x20] sm:$0xff] }
  0x16   :  { %215 = vadd.xlane.f32.xlu0 %v214_v11  ;;  %v40_v33 = vld [vmem:[#allocation2 + $0x28] sm:$0xff]  ;;  %v220_v34 = vadd.f32 %v74_v31, %v73_v30  ;;  %v137_v36 = vld [vmem:[#allocation2 + $0x330] sm:$0xff]  ;;  %v138_v37 = vld [vmem:[#allocation2 + $0x338] sm:$0xff] }
  0x17   :  { %v169_v35 = vadd.f32 %v40_v33, %v39_v32  ;;  %v103_v38 = vld [vmem:[#allocation2 + $0x220] sm:$0xff]  ;;  %v104_v39 = vld [vmem:[#allocation2 + $0x228] sm:$0xff]  ;;  %v316_v40 = vadd.f32 %v138_v37, %v137_v36  ;;  %v41_v44 = vld [vmem:[#allocation2 + $0x30] sm:$0xff] }
  0x18   :  { %v265_v41 = vadd.f32 %v104_v39, %v103_v38  ;;  %v75_v42 = vld [vmem:[#allocation2 + $0x140] sm:$0xff]  ;;  %v76_v43 = vld [vmem:[#allocation2 + $0x148] sm:$0xff]  ;;  %v42_v45 = vld [vmem:[#allocation2 + $0x38] sm:$0xff] }
  0x19   :  { %167 = vadd.xlane.f32.xlu1 %v166_v16  ;;  %v223_v46 = vadd.f32 %v76_v43, %v75_v42  ;;  %v172_v47 = vadd.f32 %v42_v45, %v41_v44  ;;  %v139_v48 = vld [vmem:[#allocation2 + $0x340] sm:$0xff]  ;;  %v140_v49 = vld [vmem:[#allocation2 + $0x348] sm:$0xff]  ;;  %v105_v50 = vld [vmem:[#allocation2 + $0x230] sm:$0xff] }
  0x1a   :  { %164 = vadd.xlane.f32.xlu0 %v163_v17  ;;  %v106_v51 = vld [vmem:[#allocation2 + $0x238] sm:$0xff]  ;;  %v319_v52 = vadd.f32 %v140_v49, %v139_v48  ;;  %v77_v54 = vld [vmem:[#allocation2 + $0x150] sm:$0xff]  ;;  %v43_v56 = vld [vmem:[#allocation2 + $0x40] sm:$0xff] }
  0x1b   :  { %v268_v53 = vadd.f32 %v106_v51, %v105_v50  ;;  %v78_v55 = vld [vmem:[#allocation2 + $0x158] sm:$0xff]  ;;  %v44_v57 = vld [vmem:[#allocation2 + $0x48] sm:$0xff]  ;;  %v141_v60 = vld [vmem:[#allocation2 + $0x350] sm:$0xff] }
  0x1c   :  { %v226_v58 = vadd.f32 %v78_v55, %v77_v54  ;;  %v175_v59 = vadd.f32 %v44_v57, %v43_v56  ;;  %v142_v61 = vld [vmem:[#allocation2 + $0x358] sm:$0xff]  ;;  %v107_v62 = vld [vmem:[#allocation2 + $0x240] sm:$0xff]  ;;  %v108_v63 = vld [vmem:[#allocation2 + $0x248] sm:$0xff] }
  0x1d   :  { %260 = vadd.xlane.f32.xlu1 %v259_v22  ;;  %v322_v0 = vadd.f32 %v142_v61, %v141_v60  ;;  %v271_v1 = vadd.f32 %v108_v63, %v107_v62  ;;  %v79_v2 = vld [vmem:[#allocation2 + $0x160] sm:$0xff]  ;;  %v80_v3 = vld [vmem:[#allocation2 + $0x168] sm:$0xff]  ;;  %v45_v4 = vld [vmem:[#allocation2 + $0x50] sm:$0xff] }
  0x1e   :  { %218 = vadd.xlane.f32.xlu0 %v217_v23  ;;  %v46_v5 = vld [vmem:[#allocation2 + $0x58] sm:$0xff]  ;;  %v229_v6 = vadd.f32 %v80_v3, %v79_v2  ;;  %v143_v8 = vld [vmem:[#allocation2 + $0x360] sm:$0xff]  ;;  %v144_v9 = vld [vmem:[#allocation2 + $0x368] sm:$0xff] }
  0x1f   :  { %v178_v7 = vadd.f32 %v46_v5, %v45_v4  ;;  %v109_v10 = vld [vmem:[#allocation2 + $0x250] sm:$0xff]  ;;  %v110_v11 = vld [vmem:[#allocation2 + $0x258] sm:$0xff]  ;;  %v325_v12 = vadd.f32 %v144_v9, %v143_v8  ;;  %v47_v16 = vld [vmem:[#allocation2 + $0x60] sm:$0xff] }
  0x20   :  { %v274_v13 = vadd.f32 %v110_v11, %v109_v10  ;;  %v81_v14 = vld [vmem:[#allocation2 + $0x170] sm:$0xff]  ;;  %v82_v15 = vld [vmem:[#allocation2 + $0x178] sm:$0xff]  ;;  %v48_v17 = vld [vmem:[#allocation2 + $0x68] sm:$0xff] }
  0x21   :  { %314 = vadd.xlane.f32.xlu1 %v313_v28  ;;  %v232_v18 = vadd.f32 %v82_v15, %v81_v14  ;;  %v181_v19 = vadd.f32 %v48_v17, %v47_v16  ;;  %v145_v20 = vld [vmem:[#allocation2 + $0x370] sm:$0xff]  ;;  %v146_v21 = vld [vmem:[#allocation2 + $0x378] sm:$0xff]  ;;  %v111_v22 = vld [vmem:[#allocation2 + $0x260] sm:$0xff] }
  0x22   :  { %263 = vadd.xlane.f32.xlu0 %v262_v29  ;;  %v112_v23 = vld [vmem:[#allocation2 + $0x268] sm:$0xff]  ;;  %v328_v24 = vadd.f32 %v146_v21, %v145_v20  ;;  %v83_v26 = vld [vmem:[#allocation2 + $0x180] sm:$0xff]  ;;  %v49_v28 = vld [vmem:[#allocation2 + $0x70] sm:$0xff] }
  0x23   :  { %v277_v25 = vadd.f32 %v112_v23, %v111_v22  ;;  %v84_v27 = vld [vmem:[#allocation2 + $0x188] sm:$0xff]  ;;  %v50_v29 = vld [vmem:[#allocation2 + $0x78] sm:$0xff]  ;;  %v147_v32 = vld [vmem:[#allocation2 + $0x380] sm:$0xff] }
  0x24   :  { %v235_v30 = vadd.f32 %v84_v27, %v83_v26  ;;  %v184_v31 = vadd.f32 %v50_v29, %v49_v28  ;;  %v148_v33 = vld [vmem:[#allocation2 + $0x388] sm:$0xff]  ;;  %v85_v38 = vld [vmem:[#allocation2 + $0x190] sm:$0xff]  ;;  %v86_v39 = vld [vmem:[#allocation2 + $0x198] sm:$0xff] }
  0x25   :  { %221 = vadd.xlane.f32.xlu1 %v220_v34  ;;  %v113_v34 = vld [vmem:[#allocation2 + $0x270] sm:$0xff]  ;;  %v331_v36 = vadd.f32 %v148_v33, %v147_v32  ;;  %v238_v42 = vadd.f32 %v86_v39, %v85_v38  ;;  %v150_v45 = vld [vmem:[#allocation2 + $0x398] sm:$0xff]  ;;  %v87_v50 = vld [vmem:[#allocation2 + $0x1a0] sm:$0xff] }
  0x26   :  { %170 = vadd.xlane.f32.xlu0 %v169_v35  ;;  %v114_v35 = vld [vmem:[#allocation2 + $0x278] sm:$0xff]  ;;  %v149_v44 = vld [vmem:[#allocation2 + $0x390] sm:$0xff]  ;;  %v88_v51 = vld [vmem:[#allocation2 + $0x1a8] sm:$0xff] }
  0x27   :  { %v280_v37 = vadd.f32 %v114_v35, %v113_v34  ;;  %v334_v48 = vadd.f32 %v150_v45, %v149_v44  ;;  %v241_v54 = vadd.f32 %v88_v51, %v87_v50  ;;  %v151_v56 = vld [vmem:[#allocation2 + $0x3a0] sm:$0xff]  ;;  %v152_v57 = vld [vmem:[#allocation2 + $0x3a8] sm:$0xff]  ;;  %v89_v62 = vld [vmem:[#allocation2 + $0x1b0] sm:$0xff] }
  0x28   :  { %v337_v60 = vadd.f32 %v152_v57, %v151_v56  ;;  %v90_v63 = vld [vmem:[#allocation2 + $0x1b8] sm:$0xff]  ;;  %v153_v4 = vld [vmem:[#allocation2 + $0x3b0] sm:$0xff]  ;;  %v91_v10 = vld [vmem:[#allocation2 + $0x1c0] sm:$0xff] }
  0x29   :  { %317 = vadd.xlane.f32.xlu1 %v316_v40  ;;  %v51_v40 = vld [vmem:[#allocation2 + $0x80] sm:$0xff]  ;;  %v244_v2 = vadd.f32 %v90_v63, %v89_v62  ;;  %v154_v5 = vld [vmem:[#allocation2 + $0x3b8] sm:$0xff]  ;;  %v92_v11 = vld [vmem:[#allocation2 + $0x1c8] sm:$0xff] }
  0x2a   :  { %266 = vadd.xlane.f32.xlu0 %v265_v41  ;;  %v52_v41 = vld [vmem:[#allocation2 + $0x88] sm:$0xff]  ;;  %v340_v8 = vadd.f32 %v154_v5, %v153_v4  ;;  %v247_v14 = vadd.f32 %v92_v11, %v91_v10  ;;  %v155_v16 = vld [vmem:[#allocation2 + $0x3c0] sm:$0xff]  ;;  %v93_v22 = vld [vmem:[#allocation2 + $0x1d0] sm:$0xff] }
  0x2b   :  { %v187_v43 = vadd.f32 %v52_v41, %v51_v40  ;;  %v156_v17 = vld [vmem:[#allocation2 + $0x3c8] sm:$0xff]  ;;  %v94_v23 = vld [vmem:[#allocation2 + $0x1d8] sm:$0xff]  ;;  %v157_v28 = vld [vmem:[#allocation2 + $0x3d0] sm:$0xff] }
  0x2c   :  { %v343_v20 = vadd.f32 %v156_v17, %v155_v16  ;;  %v250_v26 = vadd.f32 %v94_v23, %v93_v22  ;;  %v158_v29 = vld [vmem:[#allocation2 + $0x3d8] sm:$0xff]  ;;  %v95_v34 = vld [vmem:[#allocation2 + $0x1e0] sm:$0xff]  ;;  %v96_v35 = vld [vmem:[#allocation2 + $0x1e8] sm:$0xff] }
  0x2d   :  { %224 = vadd.xlane.f32.xlu1 %v223_v46  ;;  %v115_v46 = vld [vmem:[#allocation2 + $0x280] sm:$0xff]  ;;  %v346_v32 = vadd.f32 %v158_v29, %v157_v28  ;;  %v253_v38 = vadd.f32 %v96_v35, %v95_v34  ;;  %v160_v41 = vld [vmem:[#allocation2 + $0x3e8] sm:$0xff]  ;;  %v450_v45 = vld [vmem:[%s2376_s1 + $0xf8] sm:$0xff] }
  0x2e   :  { %173 = vadd.xlane.f32.xlu0 %v172_v47  ;;  %v116_v47 = vld [vmem:[#allocation2 + $0x288] sm:$0xff]  ;;  %v159_v40 = vld [vmem:[#allocation2 + $0x3e0] sm:$0xff]  ;;  %1606 = vmatprep.subr.mxu0 %v450_v45  ;;  %v161_v57 = vld [vmem:[#allocation2 + $0x3f0] sm:$0xff] }
  0x2f   :  { %v283_v49 = vadd.f32 %v116_v47, %v115_v46  ;;  %v349_v44 = vadd.f32 %v160_v41, %v159_v40  ;;  %v97_v47 = vld [vmem:[#allocation2 + $0x1f0] sm:$0xff]  ;;  %v63_v50 = vld [vmem:[#allocation2 + $0xe0] sm:$0xff]  ;;  %v64_v51 = vld [vmem:[#allocation2 + $0xe8] sm:$0xff] }
  0x30   :  { %v205_v56 = vadd.f32 %v64_v51, %v63_v50  ;;  %v447_v62 = vld [vmem:[%s2376_s1 + $0xe0] sm:$0xff]  ;;  %v130_v4 = vld [vmem:[#allocation2 + $0x2f8] sm:$0xff]  ;;  %v444_v11 = vld [vmem:[%s2376_s1 + $0xc8] sm:$0xff] }
  0x31   :  { %320 = vadd.xlane.f32.xlu1 %v319_v52  ;;  %v53_v52 = vld [vmem:[#allocation2 + $0x90] sm:$0xff]  ;;  %v431_v63 = vld [vmem:[%s2376_s1 + $0x60] sm:$0xff]  ;;  %v430_v5 = vld [vmem:[%s2376_s1 + $0x58] sm:$0xff] }
  0x32   :  { %269 = vadd.xlane.f32.xlu0 %v268_v53  ;;  %v54_v53 = vld [vmem:[#allocation2 + $0x98] sm:$0xff]  ;;  %v439_v22 = vld [vmem:[%s2376_s1 + $0xa0] sm:$0xff]  ;;  %v436_v28 = vld [vmem:[%s2376_s1 + $0x88] sm:$0xff] }
  0x33   :  { %v190_v55 = vadd.f32 %v54_v53, %v53_v52  ;;  %v449_v52 = vld [vmem:[%s2376_s1 + $0xf0] sm:$0xff]  ;;  %v442_v16 = vld [vmem:[%s2376_s1 + $0xb8] sm:$0xff]  ;;  %v423_v23 = vld [vmem:[%s2376_s1 + $0x20] sm:$0xff] }
  0x34   :  { %v433_v53 = vld [vmem:[%s2376_s1 + $0x70] sm:$0xff]  ;;  %v426_v17 = vld [vmem:[%s2376_s1 + $0x38] sm:$0xff] }
  0x35   :  { %227 = vadd.xlane.f32.xlu1 %v226_v58  ;;  %v117_v58 = vld [vmem:[#allocation2 + $0x290] sm:$0xff]  ;;  %v961_v35 = vld [vmem:[%s2378_s3 + $0x78] sm:$0xff] }
  0x36   :  { %176 = vadd.xlane.f32.xlu0 %v175_v59  ;;  %v118_v59 = vld [vmem:[#allocation2 + $0x298] sm:$0xff]  ;;  %994 = vmatprep.subr.mxu1 %v961_v35  ;;  %v956_v41 = vld [vmem:[%s2378_s3 + $0x50] sm:$0xff] }
  0x37   :  { %v286_v61 = vadd.f32 %v118_v59, %v117_v58  ;;  %v162_v58 = vld [vmem:[#allocation2 + $0x3f8] sm:$0xff]  ;;  %v432_v59 = vld [vmem:[%s2376_s1 + $0x68] sm:$0xff] }
  0x38   :  { %v957_v40 = vld [vmem:[%s2378_s3 + $0x58] sm:$0xff] }
  0x39   :  { %323 = vadd.xlane.f32.xlu1 %v322_v0  ;;  %v55_v0 = vld [vmem:[#allocation2 + $0xa0] sm:$0xff] }
  0x3a   :  { %272 = vadd.xlane.f32.xlu0 %v271_v1  ;;  %v56_v1 = vld [vmem:[#allocation2 + $0xa8] sm:$0xff] }
  0x3b   :  { %v193_v3 = vadd.f32 %v56_v1, %v55_v0  ;;  %v352_v0 = vadd.f32 %v162_v58, %v161_v57  ;;  %v446_v1 = vld [vmem:[%s2376_s1 + $0xd8] sm:$0xff] }
  0x3d   :  { %230 = vadd.xlane.f32.xlu1 %v229_v6  ;;  %v119_v6 = vld [vmem:[#allocation2 + $0x2a0] sm:$0xff] }
  0x3e   :  { %179 = vadd.xlane.f32.xlu0 %v178_v7  ;;  %v120_v7 = vld [vmem:[#allocation2 + $0x2a8] sm:$0xff] }
  0x3f   :  { %v289_v9 = vadd.f32 %v120_v7, %v119_v6  ;;  %v65_v6 = vld [vmem:[#allocation2 + $0xf0] sm:$0xff]  ;;  %v66_v7 = vld [vmem:[#allocation2 + $0xf8] sm:$0xff] }
  0x41   :  { %326 = vadd.xlane.f32.xlu1 %v325_v12  ;;  %v57_v12 = vld [vmem:[#allocation2 + $0xb0] sm:$0xff] }
  0x42   :  { %275 = vadd.xlane.f32.xlu0 %v274_v13  ;;  %v58_v13 = vld [vmem:[#allocation2 + $0xb8] sm:$0xff] }
  0x43   :  { %v196_v15 = vadd.f32 %v58_v13, %v57_v12  ;;  %v208_v12 = vadd.f32 %v66_v7, %v65_v6  ;;  %v428_v13 = vld [vmem:[%s2376_s1 + $0x48] sm:$0xff] }
  0x45   :  { %233 = vadd.xlane.f32.xlu1 %v232_v18  ;;  %v121_v18 = vld [vmem:[#allocation2 + $0x2b0] sm:$0xff] }
  0x46   :  { %182 = vadd.xlane.f32.xlu0 %v181_v19  ;;  %v122_v19 = vld [vmem:[#allocation2 + $0x2b8] sm:$0xff] }
  0x47   :  { %v292_v21 = vadd.f32 %v122_v19, %v121_v18  ;;  %v441_v18 = vld [vmem:[%s2376_s1 + $0xb0] sm:$0xff] }
  0x48   :  { %v425_v19 = vld [vmem:[%s2376_s1 + $0x30] sm:$0xff] }
  0x49   :  { %329 = vadd.xlane.f32.xlu1 %v328_v24  ;;  %v59_v24 = vld [vmem:[#allocation2 + $0xc0] sm:$0xff] }
  0x4a   :  { %278 = vadd.xlane.f32.xlu0 %v277_v25  ;;  %v60_v25 = vld [vmem:[#allocation2 + $0xc8] sm:$0xff] }
  0x4b   :  { %v199_v27 = vadd.f32 %v60_v25, %v59_v24  ;;  %v438_v24 = vld [vmem:[%s2376_s1 + $0x98] sm:$0xff] }
  0x4c   :  { %v422_v25 = vld [vmem:[%s2376_s1 + $0x18] sm:$0xff] }
  0x4d   :  { %236 = vadd.xlane.f32.xlu1 %v235_v30  ;;  %v123_v30 = vld [vmem:[#allocation2 + $0x2c0] sm:$0xff] }
  0x4e   :  { %185 = vadd.xlane.f32.xlu0 %v184_v31  ;;  %v124_v31 = vld [vmem:[#allocation2 + $0x2c8] sm:$0xff] }
  0x4f   :  { %v295_v33 = vadd.f32 %v124_v31, %v123_v30  ;;  %v420_v30 = vld [vmem:[%s2376_s1 + $0x8] sm:$0xff]  ;;  %v435_v31 = vld [vmem:[%s2376_s1 + $0x80] sm:$0xff] }
  0x51   :  { %332 = vadd.xlane.f32.xlu1 %v331_v36  ;;  %v61_v36 = vld [vmem:[#allocation2 + $0xd0] sm:$0xff] }
  0x52   :  { %281 = vadd.xlane.f32.xlu0 %v280_v37  ;;  %v62_v37 = vld [vmem:[#allocation2 + $0xd8] sm:$0xff] }
  0x53   :  { %v202_v39 = vadd.f32 %v62_v37, %v61_v36  ;;  %v960_v36 = vld [vmem:[%s2378_s3 + $0x70] sm:$0xff]  ;;  %v959_v37 = vld [vmem:[%s2378_s3 + $0x68] sm:$0xff] }
  0x54   :  { %995 = vmatpush1.msra.mxu1 %v960_v36 }
  0x55   :  { %239 = vadd.xlane.f32.xlu1 %v238_v42  ;;  %v125_v42 = vld [vmem:[#allocation2 + $0x2d0] sm:$0xff]  ;;  %996 = vmatprep.subr.mxu1 %v959_v37 }
  0x56   :  { %188 = vadd.xlane.f32.xlu0 %v187_v43  ;;  %v126_v43 = vld [vmem:[#allocation2 + $0x2d8] sm:$0xff] }
  0x57   :  { %v298_v46 = vadd.f32 %v126_v43, %v125_v42  ;;  %v955_v43 = vld [vmem:[%s2378_s3 + $0x48] sm:$0xff] }
  0x59   :  { %335 = vadd.xlane.f32.xlu1 %v334_v48  ;;  %v98_v48 = vld [vmem:[#allocation2 + $0x1f8] sm:$0xff] }
  0x5a   :  { %284 = vadd.xlane.f32.xlu0 %v283_v49  ;;  %v434_v49 = vld [vmem:[%s2376_s1 + $0x78] sm:$0xff] }
  0x5b   :  { %1607 = vmatpush3.msra.mxu0 %v434_v49 }
  0x5c   :  { %1608 = vmatprep.subr.mxu0 %v449_v52 }
  0x5d   :  { %242 = vadd.xlane.f32.xlu1 %v241_v54  ;;  %v256_v54 = vadd.f32 %v98_v48, %v97_v47  ;;  %1609 = vmatpush3.msra.mxu0 %v433_v53 }
  0x5e   :  { %191 = vadd.xlane.f32.xlu0 %v190_v55  ;;  %v448_v55 = vld [vmem:[%s2376_s1 + $0xe8] sm:$0xff] }
  0x5f   :  { %1610 = vmatprep.subr.mxu0 %v448_v55 }
  0x60   :  { %1611 = vmatpush3.msra.mxu0 %v432_v59 }
  0x61   :  { %338 = vadd.xlane.f32.xlu1 %v337_v60  ;;  %v127_v60 = vld [vmem:[#allocation2 + $0x2e0] sm:$0xff]  ;;  %1612 = vmatprep.subr.mxu0 %v447_v62 }
  0x62   :  { %287 = vadd.xlane.f32.xlu0 %v286_v61  ;;  %v128_v61 = vld [vmem:[#allocation2 + $0x2e8] sm:$0xff]  ;;  %1613 = vmatpush3.msra.mxu0 %v431_v63 }
  0x63   :  { %1614 = vmatprep.subr.mxu0 %v446_v1 }
  0x64   :  { %1615 = vmatpush3.msra.mxu0 %v430_v5 }
  0x65   :  { %245 = vadd.xlane.f32.xlu1 %v244_v2  ;;  %v301_v2 = vadd.f32 %v128_v61, %v127_v60 }
  0x66   :  { %194 = vadd.xlane.f32.xlu0 %v193_v3  ;;  %v129_v3 = vld [vmem:[#allocation2 + $0x2f0] sm:$0xff] }
  0x67   :  { %v304_v10 = vadd.f32 %v130_v4, %v129_v3 }
  0x69   :  { %341 = vadd.xlane.f32.xlu1 %v340_v8  ;;  %v445_v8 = vld [vmem:[%s2376_s1 + $0xd0] sm:$0xff] }
  0x6a   :  { %290 = vadd.xlane.f32.xlu0 %v289_v9  ;;  %1616 = vmatprep.subr.mxu0 %v445_v8  ;;  %v429_v9 = vld [vmem:[%s2376_s1 + $0x50] sm:$0xff] }
  0x6b   :  { %1617 = vmatpush3.msra.mxu0 %v429_v9  ;;  %v522_v9 = vlaneseq }
  0x6c   :  { %1618 = vmatprep.subr.mxu0 %v444_v11 }
  0x6d   :  { %248 = vadd.xlane.f32.xlu1 %v247_v14  ;;  %1619 = vmatpush3.msra.mxu0 %v428_v13  ;;  %v443_v14 = vld [vmem:[%s2376_s1 + $0xc0] sm:$0xff]  ;;  %v2056_v13 = vshrl.u32 %v522_v9, 7 }
  0x6e   :  { %197 = vadd.xlane.f32.xlu0 %v196_v15  ;;  %1620 = vmatprep.subr.mxu0 %v443_v14  ;;  %v427_v15 = vld [vmem:[%s2376_s1 + $0x40] sm:$0xff] }
  0x6f   :  { %1621 = vmatpush3.msra.mxu0 %v427_v15 }
  0x70   :  { %1622 = vmatprep.subr.mxu0 %v442_v16 }
  0x71   :  { %344 = vadd.xlane.f32.xlu1 %v343_v20  ;;  %1623 = vmatpush3.msra.mxu0 %v426_v17  ;;  %v440_v20 = vld [vmem:[%s2376_s1 + $0xa8] sm:$0xff] }
  0x72   :  { %293 = vadd.xlane.f32.xlu0 %v292_v21  ;;  %1624 = vmatprep.subr.mxu0 %v441_v18  ;;  %v424_v21 = vld [vmem:[%s2376_s1 + $0x28] sm:$0xff] }
  0x73   :  { %1625 = vmatpush3.msra.mxu0 %v425_v19 }
  0x74   :  { %1626 = vmatprep.subr.mxu0 %v440_v20 }
  0x75   :  { %251 = vadd.xlane.f32.xlu1 %v250_v26  ;;  %1627 = vmatpush3.msra.mxu0 %v424_v21  ;;  %v437_v26 = vld [vmem:[%s2376_s1 + $0x90] sm:$0xff] }
  0x76   :  { %200 = vadd.xlane.f32.xlu0 %v199_v27  ;;  %1628 = vmatprep.subr.mxu0 %v439_v22  ;;  %v421_v27 = vld [vmem:[%s2376_s1 + $0x10] sm:$0xff] }
  0x77   :  { %1629 = vmatpush3.msra.mxu0 %v423_v23 }
  0x78   :  { %1630 = vmatprep.subr.mxu0 %v438_v24 }
  0x79   :  { %347 = vadd.xlane.f32.xlu1 %v346_v32  ;;  %1631 = vmatpush3.msra.mxu0 %v422_v25  ;;  %v419_v32 = vld [vmem:[%s2376_s1] sm:$0xff] }
  0x7a   :  { %296 = vadd.xlane.f32.xlu0 %v295_v33  ;;  %1632 = vmatprep.subr.mxu0 %v437_v26 }
  0x7b   :  { %1633 = vmatpush3.msra.mxu0 %v421_v27 }
  0x7c   :  { %1634 = vmatprep.subr.mxu0 %v436_v28 }
  0x7d   :  { %254 = vadd.xlane.f32.xlu1 %v253_v38  ;;  %1635 = vmatpush3.msra.mxu0 %v420_v30 }
  0x7e   :  { %203 = vadd.xlane.f32.xlu0 %v202_v39  ;;  %1636 = vmatprep.subr.mxu0 %v435_v31  ;;  %v958_v39 = vld [vmem:[%s2378_s3 + $0x60] sm:$0xff] }
  0x7f   :  { %1637 = vmatpush3.msra.mxu0 %v419_v32  ;;  %997 = vmatpush1.msra.mxu1 %v958_v39 }
  0x80   :  { %998 = vmatprep.subr.mxu1 %v957_v40 }
  0x81   :  { %350 = vadd.xlane.f32.xlu1 %v349_v44  ;;  %999 = vmatpush1.msra.mxu1 %v956_v41 }
  0x82   :  { %299 = vadd.xlane.f32.xlu0 %v298_v46  ;;  %1000 = vmatprep.subr.mxu1 %v955_v43 }
  0x85   :  { %257 = vadd.xlane.f32.xlu1 %v256_v54 }
  0x86   :  { %206 = vadd.xlane.f32.xlu0 %v205_v56 }
  0x89   :  { %353 = vadd.xlane.f32.xlu1 %v352_v0 }
  0x8a   :  { %302 = vadd.xlane.f32.xlu0 %v301_v2 }
  0x8d   :  { %305 = vadd.xlane.f32.xlu1 %v304_v10 }
  0x8e   :  { %209 = vadd.xlane.f32.xlu0 %v208_v12  ;;  %v523_v12 = vand.u32 127, %v522_v9 }
  0x90   :  { %v528_v14 = vadd.s32 4294967288, %v523_v12  ;;  %v535_v16 = vadd.s32 4294967280, %v523_v12  ;;  %v542_v18 = vadd.s32 4294967272, %v523_v12  ;;  %v549_v19 = vadd.s32 4294967264, %v523_v12 }
  0x91   :  { %v556_v20 = vadd.s32 4294967256, %v523_v12  ;;  %v563_v21 = vadd.s32 4294967248, %v523_v12  ;;  %v570_v22 = vadd.s32 4294967240, %v523_v12  ;;  %v577_v23 = vadd.s32 4294967232, %v523_v12 }
  0x92   :  { %v2063_v24 = vsub.s32 %v523_v12, %v2056_v13  ;;  %v2066_v25 = vsub.s32 %v528_v14, %v2056_v13  ;;  %v584_v26 = vadd.s32 4294967224, %v523_v12  ;;  %v2071_v28 = vsub.s32 %v535_v16, %v2056_v13 }
  0x93   :  { %v591_v30 = vadd.s32 4294967216, %v523_v12  ;;  %v598_v32 = vadd.s32 4294967208, %v523_v12  ;;  %v605_v35 = vadd.s32 4294967200, %v523_v12  ;;  %v2076_v36 = vsub.s32 %v542_v18, %v2056_v13 }
  0x94   :  { %v2079_v37 = vsub.s32 %v549_v19, %v2056_v13  ;;  %v2082_v39 = vsub.s32 %v556_v20, %v2056_v13  ;;  %v612_v40 = vadd.s32 4294967192, %v523_v12  ;;  %v2086_v43 = vsub.s32 %v563_v21, %v2056_v13 }
  0x95   :  { %v2089_v9 = vsub.s32 %v570_v22, %v2056_v13  ;;  %v2092_v14 = vsub.s32 %v577_v23, %v2056_v13  ;;  %v2098_v20 = vsub.s32 %v584_v26, %v2056_v13  ;;  %v2104_v22 = vsub.s32 %v591_v30, %v2056_v13 }
  0x96   :  { %v2109_v23 = vsub.s32 %v598_v32, %v2056_v13 }
  0x97   :  { %2386 = vst [vmem:[#allocation9_spill] sm:$0xff] %v2098_v20  ;;  %2387 = vst [vmem:[#allocation10_spill] sm:$0xff] %v2104_v22  ;;  %v626_v20 = vadd.s32 4294967176, %v523_v12 }
  0x9a   :  { %v1954_v29 = vpop.xlane.xlu1 %308 }
  0x9b   :  { %v1965_v33 = vpop.xlane.xlu0 %212  ;;  %v403_v21 = vmul.f32 0.00390625, %v1954_v29  ;;  %v2118_v29 = vsub.s32 %v612_v40, %v2056_v13 }
  0x9d   :  { %2390 = vst [vmem:[#allocation13_spill] sm:$0xff] %v2118_v29 }
  0x9e   :  { %v1967_v34 = vpop.xlane.xlu1 %311 }
  0x9f   :  { %v1978_v38 = vpop.xlane.xlu0 %215  ;;  %v404_v41 = vmul.f32 0.00390625, %v1967_v34 }
  0xa0   :  { %v372_v16 = vmul.f32 0.00390625, %v1978_v38  ;;  %v2112_v38 = vsub.s32 %v605_v35, %v2056_v13 }
  0xa1   :  { %v798_v30 = vrot.slane %v404_v41, %v2066_v25 }
  0xa2   :  { %v1989_v42 = vpop.xlane.xlu1 %167  ;;  %2389 = vst [vmem:[#allocation12_spill] sm:$0xff] %v2112_v38  ;;  %v640_v32 = vrot.slane %v372_v16, %v2066_v25 }
  0xa3   :  { %v1994_v44 = vpop.xlane.xlu0 %164  ;;  %v356_v18 = vmul.f32 0.00390625, %v1989_v42  ;;  %v371_v42 = vmul.f32 0.00390625, %v1965_v33 }
  0xa4   :  { %v355_v19 = vmul.f32 0.00390625, %v1994_v44 }
  0xa5   :  { %v532_v35 = vrot.slane %v356_v18, %v2066_v25  ;;  %v636_v16 = vrot.slane %v371_v42, %v2063_v24 }
  0xa6   :  { %v1996_v45 = vpop.xlane.xlu1 %260  ;;  %v527_v38 = vrot.slane %v355_v19, %v2063_v24 }
  0xa7   :  { %v1998_v46 = vpop.xlane.xlu0 %218  ;;  %v387_v40 = vmul.f32 0.00390625, %v1996_v45 }
  0xa8   :  { %v373_v44 = vmul.f32 0.00390625, %v1998_v46  ;;  %v534_v42 = vsel %vm533_vm0, %v532_v35, %v527_v38 }
  0xaa   :  { %v2000_v47 = vpop.xlane.xlu1 %314  ;;  %v645_v18 = vrot.slane %v373_v44, %v2071_v28 }
  0xab   :  { %v2002_v48 = vpop.xlane.xlu0 %263  ;;  %v405_v26 = vmul.f32 0.00390625, %v2000_v47  ;;  %v794_v47 = vrot.slane %v403_v21, %v2063_v24 }
  0xac   :  { %v388_v22 = vmul.f32 0.00390625, %v2002_v48 }
  0xad   :  { %v803_v19 = vrot.slane %v405_v26, %v2071_v28  ;;  %v799_v29 = vsel %vm533_vm0, %v798_v30, %v794_v47  ;;  %v715_v30 = vrot.slane %v387_v40, %v2063_v24 }
  0xae   :  { %v2004_v49 = vpop.xlane.xlu1 %221  ;;  %v719_v21 = vrot.slane %v388_v22, %v2066_v25 }
  0xaf   :  { %v2006_v50 = vpop.xlane.xlu0 %170  ;;  %v374_v33 = vmul.f32 0.00390625, %v2004_v49  ;;  %v804_v38 = vsel %vm540_vm1, %v803_v19, %v799_v29 }
  0xb0   :  { %v357_v41 = vmul.f32 0.00390625, %v2006_v50  ;;  %v2144_v50 = vsub.s32 %v626_v20, %v2056_v13 }
  0xb1   :  { %v650_v44 = vrot.slane %v374_v33, %v2076_v36  ;;  %v720_v33 = vsel %vm533_vm0, %v719_v21, %v715_v30 }
  0xb2   :  { %v2008_v51 = vpop.xlane.xlu1 %317  ;;  %v539_v25 = vrot.slane %v357_v41, %v2071_v28 }
  0xb3   :  { %v2010_v52 = vpop.xlane.xlu0 %266  ;;  %v406_v48 = vmul.f32 0.00390625, %v2008_v51  ;;  %v641_v51 = vsel %vm533_vm0, %v640_v32, %v636_v16  ;;  %vm974_vm0 = vcmask 523264  }
  0xb4   :  { %v389_v49 = vmul.f32 0.00390625, %v2010_v52  ;;  %v646_v32 = vsel %vm540_vm1, %v645_v18, %v641_v51 }
  0xb6   :  { %v2012_v53 = vpop.xlane.xlu1 %224  ;;  %v724_v35 = vrot.slane %v389_v49, %v2071_v28 }
  0xb7   :  { %v2014_v54 = vpop.xlane.xlu0 %173  ;;  %v375_v26 = vmul.f32 0.00390625, %v2012_v53 }
  0xb8   :  { %v358_v20 = vmul.f32 0.00390625, %v2014_v54  ;;  %v651_v54 = vsel %vm547_vm2, %v650_v44, %v646_v32  ;;  %v725_v18 = vsel %vm540_vm1, %v724_v35, %v720_v33 }
  0xb9   :  { %v655_v41 = vrot.slane %v375_v26, %v2079_v37 }
  0xba   :  { %v2016_v55 = vpop.xlane.xlu1 %320 }
  0xbb   :  { %v2018_v56 = vpop.xlane.xlu0 %269  ;;  %v407_v53 = vmul.f32 0.00390625, %v2016_v55  ;;  %v541_v55 = vsel %vm540_vm1, %v539_v25, %v534_v42 }
  0xbc   :  { %v390_v24 = vmul.f32 0.00390625, %v2018_v56  ;;  %v546_v56 = vrot.slane %v358_v20, %v2076_v36 }
  0xbd   :  { %v813_v19 = vrot.slane %v407_v53, %v2079_v37 }
  0xbe   :  { %v2020_v57 = vpop.xlane.xlu1 %227  ;;  %v729_v49 = vrot.slane %v390_v24, %v2076_v36 }
  0xbf   :  { %v2022_v58 = vpop.xlane.xlu0 %176  ;;  %v376_v47 = vmul.f32 0.00390625, %v2020_v57 }
  0xc0   :  { %v359_v40 = vmul.f32 0.00390625, %v2022_v58 }
  0xc1   :  { %v660_v21 = vrot.slane %v376_v47, %v2082_v39 }
  0xc2   :  { %v2024_v59 = vpop.xlane.xlu1 %323  ;;  %v553_v51 = vrot.slane %v359_v40, %v2079_v37 }
  0xc3   :  { %v2026_v60 = vpop.xlane.xlu0 %272 }
  0xc4   :  { %v391_v29 = vmul.f32 0.00390625, %v2026_v60 }
  0xc6   :  { %v2028_v61 = vpop.xlane.xlu1 %230  ;;  %v734_v26 = vrot.slane %v391_v29, %v2079_v37 }
  0xc7   :  { %v2030_v62 = vpop.xlane.xlu0 %179  ;;  %v377_v57 = vmul.f32 0.00390625, %v2028_v61  ;;  %v656_v61 = vsel %vm554_vm3, %v655_v41, %v651_v54 }
  0xc8   :  { %v661_v35 = vsel %vm561_vm4, %v660_v21, %v656_v61 }
  0xca   :  { %v2032_v63 = vpop.xlane.xlu1 %326 }
  0xcb   :  { %v2034_v0 = vpop.xlane.xlu0 %275  ;;  %v409_v60 = vmul.f32 0.00390625, %v2032_v63  ;;  %v665_v63 = vrot.slane %v377_v57, %v2086_v43 }
  0xcc   :  { %v392_v42 = vmul.f32 0.00390625, %v2034_v0 }
  0xcd   :  { %v823_v37 = vrot.slane %v409_v60, %v2086_v43 }
  0xce   :  { %v2036_v1 = vpop.xlane.xlu1 %233 }
  0xcf   :  { %v2038_v2 = vpop.xlane.xlu0 %182  ;;  %v378_v30 = vmul.f32 0.00390625, %v2036_v1 }
  0xd1   :  { %v670_v24 = vrot.slane %v378_v30, %v2089_v9 }
  0xd2   :  { %v2040_v3 = vpop.xlane.xlu1 %329 }
  0xd3   :  { %v2042_v4 = vpop.xlane.xlu0 %278 }
  0xd4   :  { %v393_v1 = vmul.f32 0.00390625, %v2042_v4  ;;  %v666_v4 = vsel %vm568_vm5, %v665_v63, %v661_v35 }
  0xd6   :  { %v2044_v5 = vpop.xlane.xlu1 %236 }
  0xd7   :  { %v2046_v6 = vpop.xlane.xlu0 %185  ;;  %v379_v47 = vmul.f32 0.00390625, %v2044_v5 }
  0xda   :  { %v2048_v7 = vpop.xlane.xlu1 %332 }
  0xdb   :  { %v2050_v8 = vpop.xlane.xlu0 %281  ;;  %v411_v5 = vmul.f32 0.00390625, %v2048_v7 }
  0xdc   :  { %v394_v57 = vmul.f32 0.00390625, %v2050_v8 }
  0xde   :  { %v2052_v10 = vpop.xlane.xlu1 %239 }
  0xdf   :  { %v2054_v11 = vpop.xlane.xlu0 %188 }
  0xe2   :  { %v2058_v15 = vpop.xlane.xlu1 %335 }
  0xe3   :  { %v2060_v17 = vpop.xlane.xlu0 %284  ;;  %v412_v60 = vmul.f32 0.00390625, %v2058_v15 }
  0xe6   :  { %v2068_v27 = vpop.xlane.xlu1 %242 }
  0xe7   :  { %v2073_v31 = vpop.xlane.xlu0 %191  ;;  %v381_v8 = vmul.f32 0.00390625, %v2068_v27 }
  0xe8   :  { %2385 = vst [vmem:[#allocation8_spill] sm:$0xff] %v2073_v31 }
  0xea   :  { %v2100_v34 = vpop.xlane.xlu1 %338 }
  0xeb   :  { %v2106_v31 = vpop.xlane.xlu0 %287  ;;  %v413_v15 = vmul.f32 0.00390625, %v2100_v34  ;;  %v2394_v34 = vld [vmem:[#allocation10_spill] sm:$0xff] }
  0xec   :  { %2388 = vst [vmem:[#allocation11_spill] sm:$0xff] %v2106_v31  ;;  %v619_v31 = vadd.s32 4294967184, %v523_v12 }
  0xee   :  { %v2126_v46 = vpop.xlane.xlu1 %245  ;;  %v2141_v45 = vsub.s32 %v619_v31, %v2056_v13  ;;  %v808_v31 = vrot.slane %v406_v48, %v2076_v36  ;;  %v408_v48 = vmul.f32 0.00390625, %v2024_v59  ;;  %v360_v59 = vmul.f32 0.00390625, %v2030_v62 }
  0xef   :  { %v2132_v12 = vpop.xlane.xlu0 %194  ;;  %v548_v62 = vsel %vm547_vm2, %v546_v56, %v541_v55  ;;  %v361_v36 = vmul.f32 0.00390625, %v2038_v2  ;;  %v739_v2 = vrot.slane %v392_v42, %v2082_v39  ;;  %v833_v42 = vrot.slane %v411_v5, %v2092_v14  ;;  %v2391_v61 = vld [vmem:[#allocation8_spill] sm:$0xff] }
  0xf0   :  { %v809_v16 = vsel %vm547_vm2, %v808_v31, %v804_v38  ;;  %v818_v44 = vrot.slane %v408_v48, %v2082_v39  ;;  %v410_v31 = vmul.f32 0.00390625, %v2040_v3  ;;  %v560_v32 = vrot.slane %v360_v59, %v2082_v39 }
  0xf1   :  { %v814_v20 = vsel %vm554_vm3, %v813_v19, %v809_v16  ;;  %v730_v38 = vsel %vm547_vm2, %v729_v49, %v725_v18  ;;  %v555_v53 = vsel %vm554_vm3, %v553_v51, %v548_v62  ;;  %v567_v54 = vrot.slane %v361_v36, %v2086_v43 }
  0xf2   :  { %v2150_v52 = vpop.xlane.xlu1 %341  ;;  %v819_v3 = vsel %vm561_vm4, %v818_v44, %v814_v20  ;;  %v735_v33 = vsel %vm554_vm3, %v734_v26, %v730_v38  ;;  %v828_v41 = vrot.slane %v410_v31, %v2089_v9  ;;  %v362_v48 = vmul.f32 0.00390625, %v2046_v6  ;;  %v2392_v26 = vld [vmem:[#allocation9_spill] sm:$0xff] }
  0xf3   :  { %v2156_v22 = vpop.xlane.xlu0 %290  ;;  %v562_v29 = vsel %vm561_vm4, %v560_v32, %v555_v53  ;;  %v824_v55 = vsel %vm568_vm5, %v823_v37, %v819_v3  ;;  %v744_v16 = vrot.slane %v393_v1, %v2086_v43  ;;  %v740_v56 = vsel %vm561_vm4, %v739_v2, %v735_v33  ;;  %v2393_v63 = vld [vmem:[#allocation11_spill] sm:$0xff] }
  0xf4   :  { %v380_v18 = vmul.f32 0.00390625, %v2052_v10  ;;  %v363_v19 = vmul.f32 0.00390625, %v2054_v11  ;;  %v671_v6 = vsel %vm575_vm6, %v670_v24, %v666_v4  ;;  %v675_v59 = vrot.slane %v379_v47, %v2092_v14 }
  0xf5   :  { %v395_v49 = vmul.f32 0.00390625, %v2060_v17  ;;  %v569_v7 = vsel %vm568_vm5, %v567_v54, %v562_v29  ;;  %v829_v21 = vsel %vm575_vm6, %v828_v41, %v824_v55  ;;  %v574_v51 = vrot.slane %v362_v48, %v2089_v9 }
  0xf6   :  { %v2170_v28 = vpop.xlane.xlu1 %248  ;;  %v745_v11 = vsel %vm568_vm5, %v744_v16, %v740_v56  ;;  %v364_v44 = vmul.f32 0.00390625, %v2391_v61  ;;  %v749_v17 = vrot.slane %v394_v57, %v2089_v9  ;;  %v680_v30 = vrot.slane %v380_v18, %v2392_v26 }
  0xf7   :  { %v2176_v58 = vpop.xlane.xlu0 %197  ;;  %v581_v62 = vrot.slane %v363_v19, %v2092_v14  ;;  %v396_v36 = vmul.f32 0.00390625, %v2393_v63  ;;  %v676_v27 = vsel %vm582_vm7, %v675_v59, %v671_v6  ;;  %v838_v31 = vrot.slane %v412_v60, %v2392_v26 }
  0xf8   :  { %v754_v20 = vrot.slane %v395_v49, %v2092_v14  ;;  %v382_v32 = vmul.f32 0.00390625, %v2126_v46  ;;  %v576_v1 = vsel %vm575_vm6, %v574_v51, %v569_v7  ;;  %v685_v38 = vrot.slane %v381_v8, %v2394_v34  ;;  %v2395_v49 = vld [vmem:[#allocation12_spill] sm:$0xff] }
  0xf9   :  { %v365_v9 = vmul.f32 0.00390625, %v2132_v12  ;;  %v414_v35 = vmul.f32 0.00390625, %v2150_v52  ;;  %v834_v2 = vsel %vm582_vm7, %v833_v42, %v829_v21  ;;  %v588_v3 = vrot.slane %v364_v44, %v2392_v26 }
  0xfa   :  { %v2190_v25 = vpop.xlane.xlu1 %344  ;;  %v843_v33 = vrot.slane %v413_v15, %v2394_v34  ;;  %v397_v14 = vmul.f32 0.00390625, %v2156_v22  ;;  %v750_v46 = vsel %vm575_vm6, %v749_v17, %v745_v11  ;;  %v681_v24 = vsel %vm589_vm8, %v680_v30, %v676_v27 }
  0xfb   :  { %v2196_v0 = vpop.xlane.xlu0 %293  ;;  %v583_v47 = vsel %vm582_vm7, %v581_v62, %v576_v1  ;;  %v759_v12 = vrot.slane %v396_v36, %v2392_v26  ;;  %v839_v52 = vsel %vm589_vm8, %v838_v31, %v834_v2  ;;  %v755_v4 = vsel %vm582_vm7, %v754_v20, %v750_v46  ;;  %v2396_v26 = vld [vmem:[#allocation13_spill] sm:$0xff] }
  0xfc   :  { %v690_v54 = vrot.slane %v382_v32, %v2109_v23  ;;  %v383_v41 = vmul.f32 0.00390625, %v2170_v28  ;;  %v686_v22 = vsel %vm596_vm9, %v685_v38, %v681_v24  ;;  %v595_v29 = vrot.slane %v365_v9, %v2394_v34 }
  0xfd   :  { %v848_v55 = vrot.slane %v414_v35, %v2109_v23  ;;  %v415_v16 = vmul.f32 0.00390625, %v2190_v25  ;;  %v590_v56 = vsel %vm589_vm8, %v588_v3, %v583_v47  ;;  %v844_v57 = vsel %vm596_vm9, %v843_v33, %v839_v52 }
  0xfe   :  { %v2210_v40 = vpop.xlane.xlu1 %251  ;;  %v764_v18 = vrot.slane %v397_v14, %v2394_v34  ;;  %v398_v28 = vmul.f32 0.00390625, %v2196_v0  ;;  %v760_v19 = vsel %vm589_vm8, %v759_v12, %v755_v4  ;;  %v366_v6 = vmul.f32 0.00390625, %v2176_v58 }
  0xff   :  { %v2216_v39 = vpop.xlane.xlu0 %200  ;;  %v384_v59 = vmul.f32 0.00390625, %v2210_v40  ;;  %v691_v25 = vsel %vm603_vm10, %v690_v54, %v686_v22  ;;  %v695_v7 = vrot.slane %v383_v41, %v2395_v49  ;;  %v597_v11 = vsel %vm596_vm9, %v595_v29, %v590_v56 }
 0x100   :  { %v849_v0 = vsel %vm603_vm10, %v848_v55, %v844_v57  ;;  %v853_v42 = vrot.slane %v415_v16, %v2395_v49  ;;  %v765_v58 = vsel %vm596_vm9, %v764_v18, %v760_v19  ;;  %v769_v40 = vrot.slane %v398_v28, %v2109_v23 }
 0x101   :  { %v602_v17 = vrot.slane %v366_v6, %v2109_v23  ;;  %v700_v30 = vrot.slane %v384_v59, %v2396_v26  ;;  %v696_v36 = vsel %vm610_vm11, %v695_v7, %v691_v25  ;;  %v954_v25 = vld [vmem:[%s2378_s3 + $0x40] sm:$0xff]  ;;  %v951_v7 = vld [vmem:[%s2378_s3 + $0x28] sm:$0xff] }
 0x102   :  { %v348_v43 = vpop.xlane.xlu1 %347  ;;  %v770_v34 = vsel %vm603_vm10, %v769_v40, %v765_v58  ;;  %1001 = vmatpush1.msra.mxu1 %v954_v25 }
 0x103   :  { %v297_v10 = vpop.xlane.xlu0 %296  ;;  %v416_v60 = vmul.f32 0.00390625, %v348_v43  ;;  %v367_v43 = vmul.f32 0.00390625, %v2216_v39  ;;  %v701_v3 = vsel %vm617_vm12, %v700_v30, %v696_v36  ;;  %v604_v22 = vsel %vm603_vm10, %v602_v17, %v597_v11  ;;  %v947_v11 = vld [vmem:[%s2378_s3 + $0x8] sm:$0xff] }
 0x104   :  { %v399_v15 = vmul.f32 0.00390625, %v297_v10  ;;  %v966_v17 = vsub.s32 0, %v2056_v13 }
 0x105   :  { %v858_v62 = vrot.slane %v416_v60, %v2396_v26  ;;  %v609_v38 = vrot.slane %v367_v43, %v2395_v49 }
 0x106   :  { %v255_v37 = vpop.xlane.xlu1 %254  ;;  %v774_v9 = vrot.slane %v399_v15, %v2395_v49  ;;  %v952_v49 = vld [vmem:[%s2378_s3 + $0x30] sm:$0xff] }
 0x107   :  { %v204_v53 = vpop.xlane.xlu0 %203  ;;  %v385_v21 = vmul.f32 0.00390625, %v255_v37  ;;  %v854_v37 = vsel %vm610_vm11, %v853_v42, %v849_v0  ;;  %v946_v0 = vld [vmem:[%s2378_s3] sm:$0xff]  ;;  %v1829_v42 = vmov 0.0  }
 0x108   :  { %v368_v31 = vmul.f32 0.00390625, %v204_v53  ;;  %v859_v33 = vsel %vm617_vm12, %v858_v62, %v854_v37  ;;  %v775_v29 = vsel %vm610_vm11, %v774_v9, %v770_v34  ;;  %1042 = vmatprep.mubr.f32.mxu1 %v1829_v42  ;;  %v970_v37 = vsub.s32 1, %v2056_v13  ;;  %v1668_v42 = vld [vmem:[#allocation2 + $0x80] sm:$0xff] }
 0x109   :  { %v705_v27 = vrot.slane %v385_v21, %v2141_v45  ;;  %v950_v21 = vld [vmem:[%s2378_s3 + $0x20] sm:$0xff] }
 0x10a   :  { %v351_v48 = vpop.xlane.xlu1 %350  ;;  %v616_v14 = vrot.slane %v368_v31, %v2396_v26 }
 0x10b   :  { %v300_v5 = vpop.xlane.xlu0 %299  ;;  %v417_v51 = vmul.f32 0.00390625, %v351_v48  ;;  %v706_v47 = vsel %vm624_vm13, %v705_v27, %v701_v3 }
 0x10c   :  { %v400_v63 = vmul.f32 0.00390625, %v300_v5  ;;  %v611_v5 = vsel %vm610_vm11, %v609_v38, %v604_v22 }
 0x10d   :  { %v863_v20 = vrot.slane %v417_v51, %v2141_v45  ;;  %v949_v51 = vld [vmem:[%s2378_s3 + $0x18] sm:$0xff] }
 0x10e   :  { %v258_v8 = vpop.xlane.xlu1 %257  ;;  %v779_v2 = vrot.slane %v400_v63, %v2396_v26  ;;  %v962_v26 = vld [vmem:[%s2379_s4] sm:$0x3] }
 0x10f   :  { %v386_v61 = vmul.f32 0.00390625, %v258_v8  ;;  %v207_v44 = vpop.xlane.xlu0 %206  ;;  %v864_v12 = vsel %vm624_vm13, %v863_v20, %v859_v33  ;;  %v948_v8 = vld [vmem:[%s2378_s3 + $0x10] sm:$0xff]  ;;  %v967_v30 = vrot.slane %v962_v26, %v966_v17 }
 0x110   :  { %v369_v10 = vmul.f32 0.00390625, %v207_v44  ;;  %v780_v56 = vsel %vm617_vm12, %v779_v2, %v775_v29  ;;  %v1602_v44 = vld [vmem:[%s2377_s2] ss:$0 sm:$0xff]  ;;  %v1654_v33 = vld [vmem:[#allocation2 + $0x10] sm:$0xff]  ;;  %v1659_v29 = vld [vmem:[#allocation2 + $0x28] sm:$0xff]  ;;  %s1830_s2 = smov [#allocation5]  }
 0x111   :  { %v710_v39 = vrot.slane %v386_v61, %v2144_v50 }
 0x112   :  { %v354_v32 = vpop.xlane.xlu1 %353  ;;  %v623_v52 = vrot.slane %v369_v10, %v2141_v45 }
 0x113   :  { %v418_v1 = vmul.f32 0.00390625, %v354_v32  ;;  %v303_v23 = vpop.xlane.xlu0 %302  ;;  %v711_v41 = vsel %vm631_vm14, %v710_v39, %v706_v47  ;;  %v971_v39 = vrot.slane %v962_v26, %v970_v37  ;;  %v1656_v47 = vld [vmem:[#allocation2] sm:$0xff]  ;;  %v1671_v26 = vld [vmem:[#allocation2 + $0x78] sm:$0xff] }
 0x114   :  { %v401_v35 = vmul.f32 0.00390625, %v303_v23 }
 0x115   :  { %v868_v53 = vrot.slane %v418_v1, %v2144_v50 }
 0x116   :  { %v784_v46 = vrot.slane %v401_v35, %v2141_v45  ;;  %v306_v24 = vpop.xlane.xlu1 %305  ;;  %v618_v45 = vsel %vm617_vm12, %v616_v14, %v611_v5 }
 0x117   :  { %v402_v4 = vmul.f32 0.00390625, %v306_v24  ;;  %v210_v54 = vpop.xlane.xlu0 %209  ;;  %v869_v48 = vsel %vm631_vm14, %v868_v53, %v864_v12  ;;  %v625_v19 = vsel %vm624_vm13, %v623_v52, %v618_v45  ;;  %v1657_v52 = vld [vmem:[#allocation2 + $0x8] sm:$0xff] }
 0x118   :  { %v370_v55 = vmul.f32 0.00390625, %v210_v54  ;;  %v872_v16 = vsel %vm870_vm15, %v869_v48, %v711_v41  ;;  %v785_v28 = vsel %vm624_vm13, %v784_v46, %v780_v56  ;;  %v1655_v46 = vld [vmem:[#allocation2 + $0x18] sm:$0xff]  ;;  %v1658_v48 = vld [vmem:[#allocation2 + $0x20] sm:$0xff]  ;;  %v1661_v56 = vld [vmem:[#allocation2 + $0x48] sm:$0xff] }
 0x119   :  { %v789_v57 = vrot.slane %v402_v4, %v2144_v50  ;;  %939 = vmatprep.mubr.f32.mxu0 %v872_v16  ;;  %v1660_v16 = vld [vmem:[#allocation2 + $0x40] sm:$0xff] }
 0x11a   :  { %v630_v18 = vrot.slane %v370_v55, %v2144_v50  ;;  %v953_v50 = vld [vmem:[%s2378_s3 + $0x38] sm:$0xff]  ;;  %s1590_s3 = sshll.u32 %s1830_s2, 4  ;;  %s1591_s3 = int_to_ptr.vmem [resolvable:$true] %s1590_s3 }
 0x11b   :  { %v790_v6 = vsel %vm631_vm14, %v789_v57, %v785_v28  ;;  %1002 = vmatprep.subr.mxu1 %v953_v50  ;;  %v1662_v28 = vld [vmem:[#allocation2 + $0x30] sm:$0xff]  ;;  %v1665_v50 = vld [vmem:[#allocation2 + $0x68] sm:$0xff]  ;;  %s1802_s4 = scalar_lea.vmem %s1591_s3, 16384  ;;  %p1807_p6 = scmp.lt.s32.totalorder %s1591_s3, %s1591_s3 }
 0x11c   :  { %v632_v59 = vsel %vm631_vm14, %v630_v18, %v625_v19  ;;  %1003 = vmatpush1.msra.mxu1 %v952_v49  ;;  %p1803_p5 = scmp.ne.s32.totalorder %s1591_s3, %s1802_s4  ;;  %p1808_p7 = scmp.lt.s32.totalorder %s1802_s4, %s1802_s4 }
 0x11d   :  { %v871_v60 = vsel %vm870_vm15, %v790_v6, %v632_v59  ;;  %1004 = vmatprep.subr.mxu1 %v951_v7  ;;  %v1663_v6 = vld [vmem:[#allocation2 + $0x38] sm:$0xff] }
 0x11e   :  { %940 = vmatmul.mubr.f32.vlgmr.msra.gmra.mxu0 %v871_v60  ;;  %1005 = vmatpush1.msra.mxu1 %v950_v21  ;;  %v1664_v60 = vld [vmem:[#allocation2 + $0x60] sm:$0xff]  ;;  %p1809_p8 = por %p1808_p7, %p1807_p6 }
 0x11f   :  { %1006 = vmatprep.subr.mxu1 %v949_v51  ;;  %v1666_v51 = vld [vmem:[#allocation2 + $0x50] sm:$0xff] }
 0x120   :  { %1007 = vmatpush1.msra.mxu1 %v948_v8  ;;  %p1810_p9 = pnand %p1809_p8, %p1803_p5 }
 0x121   :  { %1008 = vmatprep.subr.mxu1 %v947_v11  ;;  %v1667_v11 = vld [vmem:[#allocation2 + $0x58] sm:$0xff] }
 0x122   :  { %1009 = vmatpush1.msra.mxu1 %v946_v0 }
 0x1de   :  { %v1638_v61 = vpop.f32.mrf.mxu0 }
 0x1e0   :  { %v1639_v58 = vpop.f32.mrf.mxu0 }
 0x1e1   :  { %v1640_v40 = vadd.f32 %v1639_v58, %v1638_v61 }
 0x1e3   :  { %v942_v43 = vadd.f32 %v1640_v40, %v1602_v44  ;;  %v1669_v44 = vld [vmem:[#allocation2 + $0x88] sm:$0xff] }
 0x1e5   :  { %v945_v15 = vmax.f32 %v942_v43, 0.0 }
 0x1e7   :  { %1603 = vmatmul.mubr.msk.f32.vlgmr.msra.gmra.mxu1 %vm974_vm0, %v945_v15  ;;  %v1670_v15 = vld [vmem:[#allocation2 + $0x70] sm:$0xff] }
 0x2a7   :  { %v1044_v62 = vpop.f32.mrf.mxu1 }
 0x2a8   :  { %v1045_v63 = vadd.f32 %v1044_v62, %v967_v30  ;;  %v1672_v62 = vld [vmem:[#allocation2 + $0xa0] sm:$0xff] }
 0x2a9   :  { %v1046_v10 = vpop.f32.mrf.mxu1 }
 0x2aa   :  { %v1604_v36 = vmul.f32 -1.442695, %v1045_v63  ;;  %v1047_v1 = vadd.f32 %v1046_v10, %v971_v39  ;;  %v1675_v39 = vld [vmem:[#allocation2 + $0x98] sm:$0xff] }
 0x2ac   :  { %1646 = vpow2.f32 %v1604_v36  ;;  %v1605_v23 = vmul.f32 -1.442695, %v1047_v1  ;;  %v1673_v36 = vld [vmem:[#allocation2 + $0xa8] sm:$0xff]  ;;  %v1676_v1 = vld [vmem:[#allocation2 + $0xc0] sm:$0xff] }
 0x2b9   :  { %v1647_v27 = vpop.eup %1646 }
 0x2ba   :  { %v1055_v31 = vadd.f32 1.0, %v1647_v27 }
 0x2bc   :  { %1648 = vrcp.f32 %v1055_v31 }
 0x2bd   :  { %1650 = vpow2.f32 %v1605_v23 }
 0x2c9   :  { %v1649_v20 = vpop.eup %1648 }
 0x2ca   :  { %v1064_v32 = vrot.slane %v1649_v20, %v966_v17  ;;  %v1198_v34 = vrot.slane %v1649_v20, %v970_v37  ;;  %v1651_v13 = vpop.eup %1650 }
 0x2cb   :  { %v1056_v38 = vadd.f32 1.0, %v1651_v13 }
 0x2cc   :  { %1070 = vbcast.lane.b32.xlu1 %v1064_v32, 264  ;;  %1066 = vbcast.lane.b32.xlu0 %v1064_v32, 256 }
 0x2cd   :  { %1652 = vrcp.f32 %v1056_v38 }
 0x2d0   :  { %1074 = vbcast.lane.b32.xlu1 %v1064_v32, 272  ;;  %1082 = vbcast.lane.b32.xlu0 %v1064_v32, 288 }
 0x2d4   :  { %1078 = vbcast.lane.b32.xlu1 %v1064_v32, 280  ;;  %1090 = vbcast.lane.b32.xlu0 %v1064_v32, 304 }
 0x2d8   :  { %1086 = vbcast.lane.b32.xlu1 %v1064_v32, 296  ;;  %1098 = vbcast.lane.b32.xlu0 %v1064_v32, 320 }
 0x2da   :  { %v1653_v9 = vpop.eup %1652 }
 0x2db   :  { %v1131_v35 = vrot.slane %v1653_v9, %v966_v17  ;;  %v2351_v2 = vrot.slane %v1653_v9, %v970_v37 }
 0x2dc   :  { %1094 = vbcast.lane.b32.xlu1 %v1064_v32, 312  ;;  %1106 = vbcast.lane.b32.xlu0 %v1064_v32, 336 }
 0x2e0   :  { %1102 = vbcast.lane.b32.xlu1 %v1064_v32, 328  ;;  %1114 = vbcast.lane.b32.xlu0 %v1064_v32, 352 }
 0x2e4   :  { %1110 = vbcast.lane.b32.xlu1 %v1064_v32, 344  ;;  %1122 = vbcast.lane.b32.xlu0 %v1064_v32, 368 }
 0x2e8   :  { %1118 = vbcast.lane.b32.xlu1 %v1064_v32, 360  ;;  %1200 = vbcast.lane.b32.xlu0 %v1198_v34, 256 }
 0x2ec   :  { %1126 = vbcast.lane.b32.xlu1 %v1064_v32, 376  ;;  %1208 = vbcast.lane.b32.xlu0 %v1198_v34, 272  ;;  %v1674_v32 = vld [vmem:[#allocation2 + $0x90] sm:$0xff] }
 0x2f0   :  { %1204 = vbcast.lane.b32.xlu1 %v1198_v34, 264  ;;  %1216 = vbcast.lane.b32.xlu0 %v1198_v34, 288 }
 0x2f4   :  { %1212 = vbcast.lane.b32.xlu1 %v1198_v34, 280  ;;  %1224 = vbcast.lane.b32.xlu0 %v1198_v34, 304 }
 0x2f8   :  { %1220 = vbcast.lane.b32.xlu1 %v1198_v34, 296  ;;  %1232 = vbcast.lane.b32.xlu0 %v1198_v34, 320 }
 0x2fc   :  { %1228 = vbcast.lane.b32.xlu1 %v1198_v34, 312  ;;  %1240 = vbcast.lane.b32.xlu0 %v1198_v34, 336 }
 0x300   :  { %1236 = vbcast.lane.b32.xlu1 %v1198_v34, 328  ;;  %1248 = vbcast.lane.b32.xlu0 %v1198_v34, 352 }
 0x304   :  { %1244 = vbcast.lane.b32.xlu1 %v1198_v34, 344  ;;  %1256 = vbcast.lane.b32.xlu0 %v1198_v34, 368 }
 0x308   :  { %1252 = vbcast.lane.b32.xlu1 %v1198_v34, 360  ;;  %1133 = vbcast.lane.b32.xlu0 %v1131_v35, 256 }
 0x30c   :  { %1260 = vbcast.lane.b32.xlu1 %v1198_v34, 376  ;;  %1141 = vbcast.lane.b32.xlu0 %v1131_v35, 272  ;;  %v1677_v34 = vld [vmem:[#allocation2 + $0xc8] sm:$0xff] }
 0x310   :  { %1137 = vbcast.lane.b32.xlu1 %v1131_v35, 264  ;;  %1149 = vbcast.lane.b32.xlu0 %v1131_v35, 288 }
 0x314   :  { %1145 = vbcast.lane.b32.xlu1 %v1131_v35, 280  ;;  %1157 = vbcast.lane.b32.xlu0 %v1131_v35, 304 }
 0x318   :  { %1153 = vbcast.lane.b32.xlu1 %v1131_v35, 296  ;;  %1165 = vbcast.lane.b32.xlu0 %v1131_v35, 320 }
 0x31c   :  { %1161 = vbcast.lane.b32.xlu1 %v1131_v35, 312  ;;  %1173 = vbcast.lane.b32.xlu0 %v1131_v35, 336 }
 0x320   :  { %1169 = vbcast.lane.b32.xlu1 %v1131_v35, 328  ;;  %1181 = vbcast.lane.b32.xlu0 %v1131_v35, 352 }
 0x324   :  { %1177 = vbcast.lane.b32.xlu1 %v1131_v35, 344  ;;  %1189 = vbcast.lane.b32.xlu0 %v1131_v35, 368 }
 0x328   :  { %1185 = vbcast.lane.b32.xlu1 %v1131_v35, 360  ;;  %1267 = vbcast.lane.b32.xlu0 %v2351_v2, 256 }
 0x32c   :  { %1193 = vbcast.lane.b32.xlu1 %v1131_v35, 376  ;;  %1275 = vbcast.lane.b32.xlu0 %v2351_v2, 272  ;;  %v1678_v35 = vld [vmem:[#allocation2 + $0xb0] sm:$0xff] }
 0x330   :  { %1271 = vbcast.lane.b32.xlu1 %v2351_v2, 264  ;;  %1283 = vbcast.lane.b32.xlu0 %v2351_v2, 288 }
 0x334   :  { %1279 = vbcast.lane.b32.xlu1 %v2351_v2, 280  ;;  %1291 = vbcast.lane.b32.xlu0 %v2351_v2, 304 }
 0x338   :  { %1287 = vbcast.lane.b32.xlu1 %v2351_v2, 296  ;;  %1299 = vbcast.lane.b32.xlu0 %v2351_v2, 320 }
 0x33c   :  { %1295 = vbcast.lane.b32.xlu1 %v2351_v2, 312  ;;  %1307 = vbcast.lane.b32.xlu0 %v2351_v2, 336 }
 0x33e   :  { %v1071_v53 = vpop.permute.xlu1 %1070  ;;  %v1067_v3 = vpop.permute.xlu0 %1066 }
 0x33f   :  { %v1331_v14 = vmul.f32 %v1654_v33, %v1071_v53  ;;  %v1332_v24 = vmul.f32 %v1655_v46, %v1071_v53  ;;  %v1329_v12 = vmul.f32 %v1656_v47, %v1067_v3  ;;  %v1330_v4 = vmul.f32 %v1657_v52, %v1067_v3  ;;  %v1679_v53 = vld [vmem:[#allocation2 + $0xb8] sm:$0xff]  ;;  %v1680_v33 = vld [vmem:[#allocation2 + $0xe0] sm:$0xff]  ;;  %v1681_v46 = vld [vmem:[#allocation2 + $0xe8] sm:$0xff] }
 0x340   :  { %1303 = vbcast.lane.b32.xlu1 %v2351_v2, 328  ;;  %1315 = vbcast.lane.b32.xlu0 %v2351_v2, 352  ;;  %v1682_v52 = vld [vmem:[#allocation2 + $0xd0] sm:$0xff] }
 0x341   :  { %1459 = vst [vmem:[#allocation5 + $0x10] sm:$0xff] %v1331_v14  ;;  %1460 = vst [vmem:[#allocation5 + $0x18] sm:$0xff] %v1332_v24 }
 0x342   :  { %1457 = vst [vmem:[#allocation5] sm:$0xff] %v1329_v12  ;;  %1458 = vst [vmem:[#allocation5 + $0x8] sm:$0xff] %v1330_v4  ;;  %v1075_v54 = vpop.permute.xlu1 %1074  ;;  %v1083_v41 = vpop.permute.xlu0 %1082 }
 0x343   :  { %v1333_v22 = vmul.f32 %v1658_v48, %v1075_v54  ;;  %v1334_v55 = vmul.f32 %v1659_v29, %v1075_v54  ;;  %v1337_v5 = vmul.f32 %v1660_v16, %v1083_v41  ;;  %v1338_v57 = vmul.f32 %v1661_v56, %v1083_v41  ;;  %v1683_v54 = vld [vmem:[#allocation2 + $0xd8] sm:$0xff]  ;;  %v1684_v48 = vld [vmem:[#allocation2 + $0x200] sm:$0xff]  ;;  %v1685_v29 = vld [vmem:[#allocation2 + $0x208] sm:$0xff] }
 0x344   :  { %1311 = vbcast.lane.b32.xlu1 %v2351_v2, 344  ;;  %1323 = vbcast.lane.b32.xlu0 %v2351_v2, 368  ;;  %v1686_v56 = vld [vmem:[#allocation2 + $0xf0] sm:$0xff] }
 0x345   :  { %1461 = vst [vmem:[#allocation5 + $0x20] sm:$0xff] %v1333_v22  ;;  %1462 = vst [vmem:[#allocation5 + $0x28] sm:$0xff] %v1334_v55 }
 0x346   :  { %1465 = vst [vmem:[#allocation5 + $0x40] sm:$0xff] %v1337_v5  ;;  %1466 = vst [vmem:[#allocation5 + $0x48] sm:$0xff] %v1338_v57  ;;  %v1079_v45 = vpop.permute.xlu1 %1078  ;;  %v1091_v18 = vpop.permute.xlu0 %1090 }
 0x347   :  { %v1335_v19 = vmul.f32 %v1662_v28, %v1079_v45  ;;  %v1336_v59 = vmul.f32 %v1663_v6, %v1079_v45  ;;  %v1341_v25 = vmul.f32 %v1664_v60, %v1091_v18  ;;  %v1342_v49 = vmul.f32 %v1665_v50, %v1091_v18  ;;  %v1687_v45 = vld [vmem:[#allocation2 + $0xf8] sm:$0xff]  ;;  %v1688_v28 = vld [vmem:[#allocation2 + $0x220] sm:$0xff]  ;;  %v1689_v6 = vld [vmem:[#allocation2 + $0x228] sm:$0xff] }
 0x348   :  { %1319 = vbcast.lane.b32.xlu1 %v2351_v2, 360  ;;  %v1690_v50 = vld [vmem:[#allocation2 + $0x210] sm:$0xff] }
 0x349   :  { %1463 = vst [vmem:[#allocation5 + $0x30] sm:$0xff] %v1335_v19  ;;  %1464 = vst [vmem:[#allocation5 + $0x38] sm:$0xff] %v1336_v59 }
 0x34a   :  { %1469 = vst [vmem:[#allocation5 + $0x60] sm:$0xff] %v1341_v25  ;;  %1470 = vst [vmem:[#allocation5 + $0x68] sm:$0xff] %v1342_v49  ;;  %v1087_v7 = vpop.permute.xlu1 %1086  ;;  %v1099_v21 = vpop.permute.xlu0 %1098 }
 0x34b   :  { %v1339_v8 = vmul.f32 %v1666_v51, %v1087_v7  ;;  %v1340_v0 = vmul.f32 %v1667_v11, %v1087_v7  ;;  %v1345_v61 = vmul.f32 %v1668_v42, %v1099_v21  ;;  %v1346_v58 = vmul.f32 %v1669_v44, %v1099_v21  ;;  %v1691_v7 = vld [vmem:[#allocation2 + $0x218] sm:$0xff]  ;;  %v1692_v51 = vld [vmem:[#allocation2 + $0x240] sm:$0xff]  ;;  %v1693_v11 = vld [vmem:[#allocation2 + $0x248] sm:$0xff] }
 0x34c   :  { %1327 = vbcast.lane.b32.xlu1 %v2351_v2, 376  ;;  %v1694_v44 = vld [vmem:[#allocation2 + $0x230] sm:$0xff] }
 0x34d   :  { %1467 = vst [vmem:[#allocation5 + $0x50] sm:$0xff] %v1339_v8  ;;  %1468 = vst [vmem:[#allocation5 + $0x58] sm:$0xff] %v1340_v0 }
 0x34e   :  { %1473 = vst [vmem:[#allocation5 + $0x80] sm:$0xff] %v1345_v61  ;;  %1474 = vst [vmem:[#allocation5 + $0x88] sm:$0xff] %v1346_v58  ;;  %v1095_v40 = vpop.permute.xlu1 %1094  ;;  %v1107_v43 = vpop.permute.xlu0 %1106 }
 0x34f   :  { %v1343_v17 = vmul.f32 %v1670_v15, %v1095_v40  ;;  %v1344_v30 = vmul.f32 %v1671_v26, %v1095_v40  ;;  %v1349_v63 = vmul.f32 %v1672_v62, %v1107_v43  ;;  %v1350_v27 = vmul.f32 %v1673_v36, %v1107_v43  ;;  %v1695_v40 = vld [vmem:[#allocation2 + $0x238] sm:$0xff]  ;;  %v1696_v15 = vld [vmem:[#allocation2 + $0x260] sm:$0xff]  ;;  %v1697_v26 = vld [vmem:[#allocation2 + $0x268] sm:$0xff] }
 0x350   :  { %v1698_v36 = vld [vmem:[#allocation2 + $0x250] sm:$0xff] }
 0x351   :  { %1471 = vst [vmem:[#allocation5 + $0x70] sm:$0xff] %v1343_v17  ;;  %1472 = vst [vmem:[#allocation5 + $0x78] sm:$0xff] %v1344_v30 }
 0x352   :  { %1477 = vst [vmem:[#allocation5 + $0xa0] sm:$0xff] %v1349_v63  ;;  %1478 = vst [vmem:[#allocation5 + $0xa8] sm:$0xff] %v1350_v27  ;;  %v1103_v31 = vpop.permute.xlu1 %1102  ;;  %v1115_v20 = vpop.permute.xlu0 %1114 }
 0x353   :  { %v1347_v37 = vmul.f32 %v1674_v32, %v1103_v31  ;;  %v1348_v10 = vmul.f32 %v1675_v39, %v1103_v31  ;;  %v1353_v23 = vmul.f32 %v1676_v1, %v1115_v20  ;;  %v1354_v13 = vmul.f32 %v1677_v34, %v1115_v20  ;;  %v1699_v31 = vld [vmem:[#allocation2 + $0x258] sm:$0xff]  ;;  %v1700_v32 = vld [vmem:[#allocation2 + $0x280] sm:$0xff]  ;;  %v1701_v39 = vld [vmem:[#allocation2 + $0x288] sm:$0xff] }
 0x354   :  { %v1702_v34 = vld [vmem:[#allocation2 + $0x270] sm:$0xff] }
 0x355   :  { %1475 = vst [vmem:[#allocation5 + $0x90] sm:$0xff] %v1347_v37  ;;  %1476 = vst [vmem:[#allocation5 + $0x98] sm:$0xff] %v1348_v10 }
 0x356   :  { %1481 = vst [vmem:[#allocation5 + $0xc0] sm:$0xff] %v1353_v23  ;;  %1482 = vst [vmem:[#allocation5 + $0xc8] sm:$0xff] %v1354_v13  ;;  %v1111_v38 = vpop.permute.xlu1 %1110  ;;  %v1123_v9 = vpop.permute.xlu0 %1122 }
 0x357   :  { %v1351_v2 = vmul.f32 %v1678_v35, %v1111_v38  ;;  %v1352_v3 = vmul.f32 %v1679_v53, %v1111_v38  ;;  %v1357_v14 = vmul.f32 %v1680_v33, %v1123_v9  ;;  %v1358_v24 = vmul.f32 %v1681_v46, %v1123_v9  ;;  %v1703_v38 = vld [vmem:[#allocation2 + $0x278] sm:$0xff]  ;;  %v1704_v35 = vld [vmem:[#allocation2 + $0x2a0] sm:$0xff]  ;;  %v1705_v53 = vld [vmem:[#allocation2 + $0x2a8] sm:$0xff] }
 0x358   :  { %v1706_v46 = vld [vmem:[#allocation2 + $0x290] sm:$0xff] }
 0x359   :  { %1479 = vst [vmem:[#allocation5 + $0xb0] sm:$0xff] %v1351_v2  ;;  %1480 = vst [vmem:[#allocation5 + $0xb8] sm:$0xff] %v1352_v3 }
 0x35a   :  { %1485 = vst [vmem:[#allocation5 + $0xe0] sm:$0xff] %v1357_v14  ;;  %1486 = vst [vmem:[#allocation5 + $0xe8] sm:$0xff] %v1358_v24  ;;  %v1119_v47 = vpop.permute.xlu1 %1118  ;;  %v1201_v12 = vpop.permute.xlu0 %1200 }
 0x35b   :  { %v1355_v4 = vmul.f32 %v1682_v52, %v1119_v47  ;;  %v1356_v41 = vmul.f32 %v1683_v54, %v1119_v47  ;;  %v1393_v22 = vmul.f32 %v1684_v48, %v1201_v12  ;;  %v1394_v55 = vmul.f32 %v1685_v29, %v1201_v12  ;;  %v1707_v47 = vld [vmem:[#allocation2 + $0x298] sm:$0xff]  ;;  %v1708_v52 = vld [vmem:[#allocation2 + $0x2c0] sm:$0xff]  ;;  %v1709_v54 = vld [vmem:[#allocation2 + $0x2c8] sm:$0xff] }
 0x35c   :  { %v1710_v29 = vld [vmem:[#allocation2 + $0x2b0] sm:$0xff] }
 0x35d   :  { %1483 = vst [vmem:[#allocation5 + $0xd0] sm:$0xff] %v1355_v4  ;;  %1484 = vst [vmem:[#allocation5 + $0xd8] sm:$0xff] %v1356_v41 }
 0x35e   :  { %1521 = vst [vmem:[#allocation5 + $0x200] sm:$0xff] %v1393_v22  ;;  %1522 = vst [vmem:[#allocation5 + $0x208] sm:$0xff] %v1394_v55  ;;  %v1127_v16 = vpop.permute.xlu1 %1126  ;;  %v1209_v5 = vpop.permute.xlu0 %1208 }
 0x35f   :  { %v1359_v57 = vmul.f32 %v1686_v56, %v1127_v16  ;;  %v1360_v18 = vmul.f32 %v1687_v45, %v1127_v16  ;;  %v1397_v19 = vmul.f32 %v1688_v28, %v1209_v5  ;;  %v1398_v59 = vmul.f32 %v1689_v6, %v1209_v5  ;;  %v1711_v16 = vld [vmem:[#allocation2 + $0x2b8] sm:$0xff]  ;;  %v1712_v56 = vld [vmem:[#allocation2 + $0x2e0] sm:$0xff]  ;;  %v1713_v45 = vld [vmem:[#allocation2 + $0x2e8] sm:$0xff] }
 0x360   :  { %v1714_v6 = vld [vmem:[#allocation2 + $0x2d0] sm:$0xff] }
 0x361   :  { %1487 = vst [vmem:[#allocation5 + $0xf0] sm:$0xff] %v1359_v57  ;;  %1488 = vst [vmem:[#allocation5 + $0xf8] sm:$0xff] %v1360_v18 }
 0x362   :  { %1525 = vst [vmem:[#allocation5 + $0x220] sm:$0xff] %v1397_v19  ;;  %1526 = vst [vmem:[#allocation5 + $0x228] sm:$0xff] %v1398_v59  ;;  %v1205_v60 = vpop.permute.xlu1 %1204  ;;  %v1217_v25 = vpop.permute.xlu0 %1216 }
 0x363   :  { %v1395_v49 = vmul.f32 %v1690_v50, %v1205_v60  ;;  %v1396_v21 = vmul.f32 %v1691_v7, %v1205_v60  ;;  %v1401_v8 = vmul.f32 %v1692_v51, %v1217_v25  ;;  %v1402_v0 = vmul.f32 %v1693_v11, %v1217_v25  ;;  %v1715_v60 = vld [vmem:[#allocation2 + $0x2d8] sm:$0xff]  ;;  %v1716_v50 = vld [vmem:[#allocation2 + $0x100] sm:$0xff]  ;;  %v1717_v7 = vld [vmem:[#allocation2 + $0x108] sm:$0xff] }
 0x364   :  { %v1718_v11 = vld [vmem:[#allocation2 + $0x2f0] sm:$0xff] }
 0x365   :  { %1523 = vst [vmem:[#allocation5 + $0x210] sm:$0xff] %v1395_v49  ;;  %1524 = vst [vmem:[#allocation5 + $0x218] sm:$0xff] %v1396_v21 }
 0x366   :  { %1529 = vst [vmem:[#allocation5 + $0x240] sm:$0xff] %v1401_v8  ;;  %1530 = vst [vmem:[#allocation5 + $0x248] sm:$0xff] %v1402_v0  ;;  %v1213_v42 = vpop.permute.xlu1 %1212  ;;  %v1225_v61 = vpop.permute.xlu0 %1224 }
 0x367   :  { %v1399_v58 = vmul.f32 %v1694_v44, %v1213_v42  ;;  %v1400_v43 = vmul.f32 %v1695_v40, %v1213_v42  ;;  %v1405_v17 = vmul.f32 %v1696_v15, %v1225_v61  ;;  %v1406_v30 = vmul.f32 %v1697_v26, %v1225_v61  ;;  %v1719_v42 = vld [vmem:[#allocation2 + $0x2f8] sm:$0xff]  ;;  %v1720_v44 = vld [vmem:[#allocation2 + $0x120] sm:$0xff]  ;;  %v1721_v40 = vld [vmem:[#allocation2 + $0x128] sm:$0xff] }
 0x368   :  { %v1722_v26 = vld [vmem:[#allocation2 + $0x110] sm:$0xff] }
 0x369   :  { %1527 = vst [vmem:[#allocation5 + $0x230] sm:$0xff] %v1399_v58  ;;  %1528 = vst [vmem:[#allocation5 + $0x238] sm:$0xff] %v1400_v43 }
 0x36a   :  { %1533 = vst [vmem:[#allocation5 + $0x260] sm:$0xff] %v1405_v17  ;;  %1534 = vst [vmem:[#allocation5 + $0x268] sm:$0xff] %v1406_v30  ;;  %v1221_v62 = vpop.permute.xlu1 %1220  ;;  %v1233_v63 = vpop.permute.xlu0 %1232 }
 0x36b   :  { %v1403_v27 = vmul.f32 %v1698_v36, %v1221_v62  ;;  %v1404_v20 = vmul.f32 %v1699_v31, %v1221_v62  ;;  %v1409_v37 = vmul.f32 %v1700_v32, %v1233_v63  ;;  %v1410_v10 = vmul.f32 %v1701_v39, %v1233_v63  ;;  %v1723_v62 = vld [vmem:[#allocation2 + $0x118] sm:$0xff]  ;;  %v1724_v36 = vld [vmem:[#allocation2 + $0x140] sm:$0xff]  ;;  %v1725_v31 = vld [vmem:[#allocation2 + $0x148] sm:$0xff] }
 0x36c   :  { %v1726_v39 = vld [vmem:[#allocation2 + $0x130] sm:$0xff] }
 0x36d   :  { %1531 = vst [vmem:[#allocation5 + $0x250] sm:$0xff] %v1403_v27  ;;  %1532 = vst [vmem:[#allocation5 + $0x258] sm:$0xff] %v1404_v20 }
 0x36e   :  { %1537 = vst [vmem:[#allocation5 + $0x280] sm:$0xff] %v1409_v37  ;;  %1538 = vst [vmem:[#allocation5 + $0x288] sm:$0xff] %v1410_v10  ;;  %v1229_v1 = vpop.permute.xlu1 %1228  ;;  %v1241_v23 = vpop.permute.xlu0 %1240 }
 0x36f   :  { %v1407_v13 = vmul.f32 %v1702_v34, %v1229_v1  ;;  %v1408_v9 = vmul.f32 %v1703_v38, %v1229_v1  ;;  %v1413_v2 = vmul.f32 %v1704_v35, %v1241_v23  ;;  %v1414_v3 = vmul.f32 %v1705_v53, %v1241_v23  ;;  %v1727_v1 = vld [vmem:[#allocation2 + $0x138] sm:$0xff]  ;;  %v1728_v34 = vld [vmem:[#allocation2 + $0x160] sm:$0xff]  ;;  %v1729_v38 = vld [vmem:[#allocation2 + $0x168] sm:$0xff] }
 0x370   :  { %v1730_v53 = vld [vmem:[#allocation2 + $0x150] sm:$0xff] }
 0x371   :  { %1535 = vst [vmem:[#allocation5 + $0x270] sm:$0xff] %v1407_v13  ;;  %1536 = vst [vmem:[#allocation5 + $0x278] sm:$0xff] %v1408_v9 }
 0x372   :  { %1541 = vst [vmem:[#allocation5 + $0x2a0] sm:$0xff] %v1413_v2  ;;  %1542 = vst [vmem:[#allocation5 + $0x2a8] sm:$0xff] %v1414_v3  ;;  %v1237_v33 = vpop.permute.xlu1 %1236  ;;  %v1249_v14 = vpop.permute.xlu0 %1248 }
 0x373   :  { %v1411_v24 = vmul.f32 %v1706_v46, %v1237_v33  ;;  %v1412_v12 = vmul.f32 %v1707_v47, %v1237_v33  ;;  %v1417_v4 = vmul.f32 %v1708_v52, %v1249_v14  ;;  %v1418_v41 = vmul.f32 %v1709_v54, %v1249_v14  ;;  %v1731_v33 = vld [vmem:[#allocation2 + $0x158] sm:$0xff]  ;;  %v1732_v46 = vld [vmem:[#allocation2 + $0x180] sm:$0xff]  ;;  %v1733_v47 = vld [vmem:[#allocation2 + $0x188] sm:$0xff] }
 0x374   :  { %v1734_v54 = vld [vmem:[#allocation2 + $0x170] sm:$0xff] }
 0x375   :  { %1539 = vst [vmem:[#allocation5 + $0x290] sm:$0xff] %v1411_v24  ;;  %1540 = vst [vmem:[#allocation5 + $0x298] sm:$0xff] %v1412_v12 }
 0x376   :  { %1545 = vst [vmem:[#allocation5 + $0x2c0] sm:$0xff] %v1417_v4  ;;  %1546 = vst [vmem:[#allocation5 + $0x2c8] sm:$0xff] %v1418_v41  ;;  %v1245_v48 = vpop.permute.xlu1 %1244  ;;  %v1257_v22 = vpop.permute.xlu0 %1256 }
 0x377   :  { %v1415_v55 = vmul.f32 %v1710_v29, %v1245_v48  ;;  %v1416_v5 = vmul.f32 %v1711_v16, %v1245_v48  ;;  %v1421_v57 = vmul.f32 %v1712_v56, %v1257_v22  ;;  %v1422_v18 = vmul.f32 %v1713_v45, %v1257_v22  ;;  %v1735_v48 = vld [vmem:[#allocation2 + $0x178] sm:$0xff]  ;;  %v1736_v29 = vld [vmem:[#allocation2 + $0x1a0] sm:$0xff]  ;;  %v1737_v16 = vld [vmem:[#allocation2 + $0x1a8] sm:$0xff] }
 0x378   :  { %v1738_v45 = vld [vmem:[#allocation2 + $0x190] sm:$0xff] }
 0x379   :  { %1543 = vst [vmem:[#allocation5 + $0x2b0] sm:$0xff] %v1415_v55  ;;  %1544 = vst [vmem:[#allocation5 + $0x2b8] sm:$0xff] %v1416_v5 }
 0x37a   :  { %1549 = vst [vmem:[#allocation5 + $0x2e0] sm:$0xff] %v1421_v57  ;;  %1550 = vst [vmem:[#allocation5 + $0x2e8] sm:$0xff] %v1422_v18  ;;  %v1253_v28 = vpop.permute.xlu1 %1252  ;;  %v1134_v19 = vpop.permute.xlu0 %1133 }
 0x37b   :  { %v1419_v59 = vmul.f32 %v1714_v6, %v1253_v28  ;;  %v1420_v25 = vmul.f32 %v1715_v60, %v1253_v28  ;;  %v1361_v49 = vmul.f32 %v1716_v50, %v1134_v19  ;;  %v1362_v21 = vmul.f32 %v1717_v7, %v1134_v19  ;;  %v1739_v28 = vld [vmem:[#allocation2 + $0x198] sm:$0xff]  ;;  %v1740_v6 = vld [vmem:[#allocation2 + $0x1c0] sm:$0xff]  ;;  %v1741_v60 = vld [vmem:[#allocation2 + $0x1c8] sm:$0xff] }
 0x37c   :  { %v1742_v7 = vld [vmem:[#allocation2 + $0x1b0] sm:$0xff] }
 0x37d   :  { %1547 = vst [vmem:[#allocation5 + $0x2d0] sm:$0xff] %v1419_v59  ;;  %1548 = vst [vmem:[#allocation5 + $0x2d8] sm:$0xff] %v1420_v25 }
 0x37e   :  { %1489 = vst [vmem:[#allocation5 + $0x100] sm:$0xff] %v1361_v49  ;;  %1490 = vst [vmem:[#allocation5 + $0x108] sm:$0xff] %v1362_v21  ;;  %v1261_v51 = vpop.permute.xlu1 %1260  ;;  %v1142_v8 = vpop.permute.xlu0 %1141 }
 0x37f   :  { %v1423_v0 = vmul.f32 %v1718_v11, %v1261_v51  ;;  %v1424_v61 = vmul.f32 %v1719_v42, %v1261_v51  ;;  %v1365_v58 = vmul.f32 %v1720_v44, %v1142_v8  ;;  %v1366_v43 = vmul.f32 %v1721_v40, %v1142_v8  ;;  %v1743_v51 = vld [vmem:[#allocation2 + $0x1b8] sm:$0xff]  ;;  %v1744_v11 = vld [vmem:[#allocation2 + $0x1e0] sm:$0xff]  ;;  %v1745_v42 = vld [vmem:[#allocation2 + $0x1e8] sm:$0xff] }
 0x380   :  { %v1746_v40 = vld [vmem:[#allocation2 + $0x1d0] sm:$0xff] }
 0x381   :  { %1551 = vst [vmem:[#allocation5 + $0x2f0] sm:$0xff] %v1423_v0  ;;  %1552 = vst [vmem:[#allocation5 + $0x2f8] sm:$0xff] %v1424_v61 }
 0x382   :  { %1493 = vst [vmem:[#allocation5 + $0x120] sm:$0xff] %v1365_v58  ;;  %1494 = vst [vmem:[#allocation5 + $0x128] sm:$0xff] %v1366_v43  ;;  %v1138_v15 = vpop.permute.xlu1 %1137  ;;  %v1150_v17 = vpop.permute.xlu0 %1149 }
 0x383   :  { %v1363_v30 = vmul.f32 %v1722_v26, %v1138_v15  ;;  %v1364_v63 = vmul.f32 %v1723_v62, %v1138_v15  ;;  %v1369_v27 = vmul.f32 %v1724_v36, %v1150_v17  ;;  %v1370_v20 = vmul.f32 %v1725_v31, %v1150_v17  ;;  %v1747_v15 = vld [vmem:[#allocation2 + $0x1d8] sm:$0xff]  ;;  %v1748_v26 = vld [vmem:[#allocation2 + $0x300] sm:$0xff]  ;;  %v1749_v62 = vld [vmem:[#allocation2 + $0x308] sm:$0xff] }
 0x384   :  { %v1750_v31 = vld [vmem:[#allocation2 + $0x1f0] sm:$0xff] }
 0x385   :  { %1491 = vst [vmem:[#allocation5 + $0x110] sm:$0xff] %v1363_v30  ;;  %1492 = vst [vmem:[#allocation5 + $0x118] sm:$0xff] %v1364_v63 }
 0x386   :  { %1497 = vst [vmem:[#allocation5 + $0x140] sm:$0xff] %v1369_v27  ;;  %1498 = vst [vmem:[#allocation5 + $0x148] sm:$0xff] %v1370_v20  ;;  %v1146_v32 = vpop.permute.xlu1 %1145  ;;  %v1158_v37 = vpop.permute.xlu0 %1157 }
 0x387   :  { %v1367_v10 = vmul.f32 %v1726_v39, %v1146_v32  ;;  %v1368_v23 = vmul.f32 %v1727_v1, %v1146_v32  ;;  %v1373_v13 = vmul.f32 %v1728_v34, %v1158_v37  ;;  %v1374_v9 = vmul.f32 %v1729_v38, %v1158_v37  ;;  %v1751_v32 = vld [vmem:[#allocation2 + $0x1f8] sm:$0xff]  ;;  %v1752_v39 = vld [vmem:[#allocation2 + $0x320] sm:$0xff]  ;;  %v1753_v1 = vld [vmem:[#allocation2 + $0x328] sm:$0xff] }
 0x388   :  { %v1754_v38 = vld [vmem:[#allocation2 + $0x310] sm:$0xff] }
 0x389   :  { %1495 = vst [vmem:[#allocation5 + $0x130] sm:$0xff] %v1367_v10  ;;  %1496 = vst [vmem:[#allocation5 + $0x138] sm:$0xff] %v1368_v23 }
 0x38a   :  { %1501 = vst [vmem:[#allocation5 + $0x160] sm:$0xff] %v1373_v13  ;;  %1502 = vst [vmem:[#allocation5 + $0x168] sm:$0xff] %v1374_v9  ;;  %v1154_v35 = vpop.permute.xlu1 %1153  ;;  %v1166_v2 = vpop.permute.xlu0 %1165 }
 0x38b   :  { %v1371_v3 = vmul.f32 %v1730_v53, %v1154_v35  ;;  %v1372_v14 = vmul.f32 %v1731_v33, %v1154_v35  ;;  %v1377_v24 = vmul.f32 %v1732_v46, %v1166_v2  ;;  %v1378_v12 = vmul.f32 %v1733_v47, %v1166_v2  ;;  %v1755_v35 = vld [vmem:[#allocation2 + $0x318] sm:$0xff]  ;;  %v1756_v53 = vld [vmem:[#allocation2 + $0x340] sm:$0xff]  ;;  %v1757_v33 = vld [vmem:[#allocation2 + $0x348] sm:$0xff] }
 0x38c   :  { %v1758_v47 = vld [vmem:[#allocation2 + $0x330] sm:$0xff] }
 0x38d   :  { %1499 = vst [vmem:[#allocation5 + $0x150] sm:$0xff] %v1371_v3  ;;  %1500 = vst [vmem:[#allocation5 + $0x158] sm:$0xff] %v1372_v14 }
 0x38e   :  { %1505 = vst [vmem:[#allocation5 + $0x180] sm:$0xff] %v1377_v24  ;;  %1506 = vst [vmem:[#allocation5 + $0x188] sm:$0xff] %v1378_v12  ;;  %v1162_v52 = vpop.permute.xlu1 %1161  ;;  %v1174_v4 = vpop.permute.xlu0 %1173 }
 0x38f   :  { %v1375_v41 = vmul.f32 %v1734_v54, %v1162_v52  ;;  %v1376_v22 = vmul.f32 %v1735_v48, %v1162_v52  ;;  %v1381_v55 = vmul.f32 %v1736_v29, %v1174_v4  ;;  %v1382_v5 = vmul.f32 %v1737_v16, %v1174_v4  ;;  %v1759_v52 = vld [vmem:[#allocation2 + $0x338] sm:$0xff]  ;;  %v1760_v54 = vld [vmem:[#allocation2 + $0x360] sm:$0xff]  ;;  %v1761_v48 = vld [vmem:[#allocation2 + $0x368] sm:$0xff] }
 0x390   :  { %v1762_v16 = vld [vmem:[#allocation2 + $0x350] sm:$0xff] }
 0x391   :  { %1503 = vst [vmem:[#allocation5 + $0x170] sm:$0xff] %v1375_v41  ;;  %1504 = vst [vmem:[#allocation5 + $0x178] sm:$0xff] %v1376_v22 }
 0x392   :  { %1509 = vst [vmem:[#allocation5 + $0x1a0] sm:$0xff] %v1381_v55  ;;  %1510 = vst [vmem:[#allocation5 + $0x1a8] sm:$0xff] %v1382_v5  ;;  %v1170_v56 = vpop.permute.xlu1 %1169  ;;  %v1182_v57 = vpop.permute.xlu0 %1181 }
 0x393   :  { %v1379_v18 = vmul.f32 %v1738_v45, %v1170_v56  ;;  %v1380_v19 = vmul.f32 %v1739_v28, %v1170_v56  ;;  %v1385_v59 = vmul.f32 %v1740_v6, %v1182_v57  ;;  %v1386_v25 = vmul.f32 %v1741_v60, %v1182_v57  ;;  %v1763_v56 = vld [vmem:[#allocation2 + $0x358] sm:$0xff]  ;;  %v1764_v45 = vld [vmem:[#allocation2 + $0x380] sm:$0xff]  ;;  %v1765_v28 = vld [vmem:[#allocation2 + $0x388] sm:$0xff] }
 0x394   :  { %v1766_v60 = vld [vmem:[#allocation2 + $0x370] sm:$0xff] }
 0x395   :  { %1507 = vst [vmem:[#allocation5 + $0x190] sm:$0xff] %v1379_v18  ;;  %1508 = vst [vmem:[#allocation5 + $0x198] sm:$0xff] %v1380_v19 }
 0x396   :  { %1513 = vst [vmem:[#allocation5 + $0x1c0] sm:$0xff] %v1385_v59  ;;  %1514 = vst [vmem:[#allocation5 + $0x1c8] sm:$0xff] %v1386_v25  ;;  %v1178_v50 = vpop.permute.xlu1 %1177  ;;  %v1190_v49 = vpop.permute.xlu0 %1189 }
 0x397   :  { %v1383_v21 = vmul.f32 %v1742_v7, %v1178_v50  ;;  %v1384_v8 = vmul.f32 %v1743_v51, %v1178_v50  ;;  %v1389_v0 = vmul.f32 %v1744_v11, %v1190_v49  ;;  %v1390_v61 = vmul.f32 %v1745_v42, %v1190_v49  ;;  %v1767_v50 = vld [vmem:[#allocation2 + $0x378] sm:$0xff]  ;;  %v1768_v7 = vld [vmem:[#allocation2 + $0x3a0] sm:$0xff]  ;;  %v1769_v51 = vld [vmem:[#allocation2 + $0x3a8] sm:$0xff] }
 0x398   :  { %v1770_v42 = vld [vmem:[#allocation2 + $0x390] sm:$0xff] }
 0x399   :  { %1511 = vst [vmem:[#allocation5 + $0x1b0] sm:$0xff] %v1383_v21  ;;  %1512 = vst [vmem:[#allocation5 + $0x1b8] sm:$0xff] %v1384_v8 }
 0x39a   :  { %1517 = vst [vmem:[#allocation5 + $0x1e0] sm:$0xff] %v1389_v0  ;;  %1518 = vst [vmem:[#allocation5 + $0x1e8] sm:$0xff] %v1390_v61  ;;  %v1186_v44 = vpop.permute.xlu1 %1185  ;;  %v1268_v58 = vpop.permute.xlu0 %1267 }
 0x39b   :  { %v1387_v43 = vmul.f32 %v1746_v40, %v1186_v44  ;;  %v1388_v17 = vmul.f32 %v1747_v15, %v1186_v44  ;;  %v1425_v30 = vmul.f32 %v1748_v26, %v1268_v58  ;;  %v1426_v63 = vmul.f32 %v1749_v62, %v1268_v58  ;;  %v1771_v44 = vld [vmem:[#allocation2 + $0x398] sm:$0xff]  ;;  %v1772_v40 = vld [vmem:[#allocation2 + $0x3c0] sm:$0xff]  ;;  %v1773_v15 = vld [vmem:[#allocation2 + $0x3c8] sm:$0xff] }
 0x39c   :  { %v1774_v62 = vld [vmem:[#allocation2 + $0x3b0] sm:$0xff] }
 0x39d   :  { %1515 = vst [vmem:[#allocation5 + $0x1d0] sm:$0xff] %v1387_v43  ;;  %1516 = vst [vmem:[#allocation5 + $0x1d8] sm:$0xff] %v1388_v17 }
 0x39e   :  { %1553 = vst [vmem:[#allocation5 + $0x300] sm:$0xff] %v1425_v30  ;;  %1554 = vst [vmem:[#allocation5 + $0x308] sm:$0xff] %v1426_v63  ;;  %v1194_v36 = vpop.permute.xlu1 %1193  ;;  %v1276_v27 = vpop.permute.xlu0 %1275 }
 0x39f   :  { %v1391_v20 = vmul.f32 %v1750_v31, %v1194_v36  ;;  %v1392_v37 = vmul.f32 %v1751_v32, %v1194_v36  ;;  %v1429_v10 = vmul.f32 %v1752_v39, %v1276_v27  ;;  %v1430_v23 = vmul.f32 %v1753_v1, %v1276_v27  ;;  %v1775_v36 = vld [vmem:[#allocation2 + $0x3b8] sm:$0xff]  ;;  %v1776_v31 = vld [vmem:[#allocation2 + $0x3e0] sm:$0xff]  ;;  %v1777_v32 = vld [vmem:[#allocation2 + $0x3e8] sm:$0xff] }
 0x3a1   :  { %1519 = vst [vmem:[#allocation5 + $0x1f0] sm:$0xff] %v1391_v20  ;;  %1520 = vst [vmem:[#allocation5 + $0x1f8] sm:$0xff] %v1392_v37 }
 0x3a2   :  { %1557 = vst [vmem:[#allocation5 + $0x320] sm:$0xff] %v1429_v10  ;;  %1558 = vst [vmem:[#allocation5 + $0x328] sm:$0xff] %v1430_v23  ;;  %v1272_v34 = vpop.permute.xlu1 %1271  ;;  %v1284_v13 = vpop.permute.xlu0 %1283  ;;  %v1778_v10 = vld [vmem:[#allocation2 + $0x3d0] sm:$0xff]  ;;  %v1779_v23 = vld [vmem:[#allocation2 + $0x3d8] sm:$0xff] }
 0x3a3   :  { %v1427_v9 = vmul.f32 %v1754_v38, %v1272_v34  ;;  %v1428_v2 = vmul.f32 %v1755_v35, %v1272_v34  ;;  %v1433_v3 = vmul.f32 %v1756_v53, %v1284_v13  ;;  %v1434_v14 = vmul.f32 %v1757_v33, %v1284_v13  ;;  %v1780_v38 = vld [vmem:[#allocation2 + $0x3f0] sm:$0xff]  ;;  %v1781_v35 = vld [vmem:[#allocation2 + $0x3f8] sm:$0xff] }
 0x3a5   :  { %1555 = vst [vmem:[#allocation5 + $0x310] sm:$0xff] %v1427_v9  ;;  %1556 = vst [vmem:[#allocation5 + $0x318] sm:$0xff] %v1428_v2 }
 0x3a6   :  { %1561 = vst [vmem:[#allocation5 + $0x340] sm:$0xff] %v1433_v3  ;;  %1562 = vst [vmem:[#allocation5 + $0x348] sm:$0xff] %v1434_v14  ;;  %v1280_v46 = vpop.permute.xlu1 %1279  ;;  %v1292_v24 = vpop.permute.xlu0 %1291 }
 0x3a7   :  { %v1431_v12 = vmul.f32 %v1758_v47, %v1280_v46  ;;  %v1432_v4 = vmul.f32 %v1759_v52, %v1280_v46  ;;  %v1437_v41 = vmul.f32 %v1760_v54, %v1292_v24  ;;  %v1438_v22 = vmul.f32 %v1761_v48, %v1292_v24 }
 0x3a9   :  { %1559 = vst [vmem:[#allocation5 + $0x330] sm:$0xff] %v1431_v12  ;;  %1560 = vst [vmem:[#allocation5 + $0x338] sm:$0xff] %v1432_v4 }
 0x3aa   :  { %1565 = vst [vmem:[#allocation5 + $0x360] sm:$0xff] %v1437_v41  ;;  %1566 = vst [vmem:[#allocation5 + $0x368] sm:$0xff] %v1438_v22  ;;  %v1288_v29 = vpop.permute.xlu1 %1287  ;;  %v1300_v55 = vpop.permute.xlu0 %1299 }
 0x3ab   :  { %v1435_v5 = vmul.f32 %v1762_v16, %v1288_v29  ;;  %v1436_v57 = vmul.f32 %v1763_v56, %v1288_v29  ;;  %v1441_v18 = vmul.f32 %v1764_v45, %v1300_v55  ;;  %v1442_v19 = vmul.f32 %v1765_v28, %v1300_v55 }
 0x3ad   :  { %1563 = vst [vmem:[#allocation5 + $0x350] sm:$0xff] %v1435_v5  ;;  %1564 = vst [vmem:[#allocation5 + $0x358] sm:$0xff] %v1436_v57 }
 0x3ae   :  { %1569 = vst [vmem:[#allocation5 + $0x380] sm:$0xff] %v1441_v18  ;;  %1570 = vst [vmem:[#allocation5 + $0x388] sm:$0xff] %v1442_v19  ;;  %v1296_v6 = vpop.permute.xlu1 %1295  ;;  %v1308_v59 = vpop.permute.xlu0 %1307 }
 0x3af   :  { %v1439_v25 = vmul.f32 %v1766_v60, %v1296_v6  ;;  %v1440_v49 = vmul.f32 %v1767_v50, %v1296_v6  ;;  %v1445_v21 = vmul.f32 %v1768_v7, %v1308_v59  ;;  %v1446_v8 = vmul.f32 %v1769_v51, %v1308_v59 }
 0x3b1   :  { %1567 = vst [vmem:[#allocation5 + $0x370] sm:$0xff] %v1439_v25  ;;  %1568 = vst [vmem:[#allocation5 + $0x378] sm:$0xff] %v1440_v49 }
 0x3b2   :  { %1573 = vst [vmem:[#allocation5 + $0x3a0] sm:$0xff] %v1445_v21  ;;  %1574 = vst [vmem:[#allocation5 + $0x3a8] sm:$0xff] %v1446_v8  ;;  %v1304_v11 = vpop.permute.xlu1 %1303  ;;  %v1316_v0 = vpop.permute.xlu0 %1315 }
 0x3b3   :  { %v1443_v61 = vmul.f32 %v1770_v42, %v1304_v11  ;;  %v1444_v58 = vmul.f32 %v1771_v44, %v1304_v11  ;;  %v1449_v43 = vmul.f32 %v1772_v40, %v1316_v0  ;;  %v1450_v17 = vmul.f32 %v1773_v15, %v1316_v0 }
 0x3b5   :  { %1571 = vst [vmem:[#allocation5 + $0x390] sm:$0xff] %v1443_v61  ;;  %1572 = vst [vmem:[#allocation5 + $0x398] sm:$0xff] %v1444_v58 }
 0x3b6   :  { %1577 = vst [vmem:[#allocation5 + $0x3c0] sm:$0xff] %v1449_v43  ;;  %1578 = vst [vmem:[#allocation5 + $0x3c8] sm:$0xff] %v1450_v17  ;;  %v1312_v26 = vpop.permute.xlu1 %1311  ;;  %v1324_v30 = vpop.permute.xlu0 %1323 }
 0x3b7   :  { %v1447_v63 = vmul.f32 %v1774_v62, %v1312_v26  ;;  %v1448_v27 = vmul.f32 %v1775_v36, %v1312_v26  ;;  %v1453_v20 = vmul.f32 %v1776_v31, %v1324_v30  ;;  %v1454_v37 = vmul.f32 %v1777_v32, %v1324_v30 }
 0x3b9   :  { %1575 = vst [vmem:[#allocation5 + $0x3b0] sm:$0xff] %v1447_v63  ;;  %1576 = vst [vmem:[#allocation5 + $0x3b8] sm:$0xff] %v1448_v27 }
 0x3ba   :  { %1581 = vst [vmem:[#allocation5 + $0x3e0] sm:$0xff] %v1453_v20  ;;  %1582 = vst [vmem:[#allocation5 + $0x3e8] sm:$0xff] %v1454_v37  ;;  %v1320_v39 = vpop.permute.xlu1 %1319 }
 0x3bb   :  { %v1451_v1 = vmul.f32 %v1778_v10, %v1320_v39  ;;  %v1452_v34 = vmul.f32 %v1779_v23, %v1320_v39 }
 0x3bd   :  { %1579 = vst [vmem:[#allocation5 + $0x3d0] sm:$0xff] %v1451_v1  ;;  %1580 = vst [vmem:[#allocation5 + $0x3d8] sm:$0xff] %v1452_v34 }
 0x3be   :  { %v1328_v13 = vpop.permute.xlu1 %1327 }
 0x3bf   :  { %v1455_v9 = vmul.f32 %v1780_v38, %v1328_v13  ;;  %v1456_v2 = vmul.f32 %v1781_v35, %v1328_v13 }
 0x3c1   :  { %1583 = vst [vmem:[#allocation5 + $0x3f0] sm:$0xff] %v1455_v9  ;;  %1584 = vst [vmem:[#allocation5 + $0x3f8] sm:$0xff] %v1456_v2 }
 0x3c2   :  { %1813 = shalt.err (!%p1810_p9)
}
 0x3c3   :  { %1596 = dma.vmem_to_hbm [thread:$0]  %s1591_s3, 16384, %s2380_s5, [#allocation4], %s1827_s21, %s1827_s21, %s1828_s22  }
 0x3c4   :  { %1824 = dma.done.wait [#allocation4], 16384  }
 0x3c5   :  { %1825 = vsyncadd [#allocation4], 4294950912 }
 0x3c6   :  { %1600 = vsyncpa [#allocation3], 1 }
 0x3c7   :  { %1601 = vsyncpa [#allocation4], 1 }

</bundles_post_ra>
